<compile_context>
chip_gen: v6e
topology: v6e:2x2x1
jax: 0.10.0
libtpu: 0.0.40
codegen_flags: <defaults>
</compile_context>

<pallas_src>
import functools

import jax
import jax.numpy as jnp
from jax import lax
from jax.experimental import pallas as pl
from jax.experimental.pallas import tpu as pltpu


# --------------------------------------------------------------------------------------
# Fused kernel.  One grid step == one batch image.
#
# Width-folded layout: a (Hy, Wx, C) image is held as (Hy, Wx//2, 2*C) with folded
# channel index  kw*C + c  for width column  2*u + kw.
#
# Scratch z_ref holds the padded, folded  z = x_skip + pad(upsample(x))  image with a
# 1-column / 1-row zero halo for the 3x3 conv.  The interior starts at (row 1, col 8) so
# that the big interior store is sublane-aligned; conv windows are value slices of full
# row blocks (offsets 7..9), which is cheap and lowers cleanly.
# --------------------------------------------------------------------------------------
def _mdp_fused_kernel(x_ref, skip_ref, wup_ref, bup_ref, wf_ref, scale_ref, shift_ref,
                      o_ref, z_ref, *, H, W, Hs, Wf, Cup, Cout, pads):
    padtop, padbot, padleft, padright = pads
    c2up = 2 * Cup
    c2out = 2 * Cout
    cd = z_ref.dtype  # MXU operand dtype (f32 by default, optionally bf16)

    # ---- 1) ConvTranspose2d(k=2, s=2): two MXU matmuls, one per output-row parity -----
    # taps_kh[i*W + j, kw*Cup + c] = up[2i+kh, 2j+kw, c]  (bias included)
    x2 = x_ref[0].astype(cd)                                   # (H*W, Cin)
    bup = bup_ref[...]                                         # (1, 2*Cup), f32
    row_par = []
    for kh in range(2):
        t = jnp.dot(x2, wup_ref[kh], preferred_element_type=jnp.float32) + bup
        row_par.append(t.reshape(H, W, c2up))                  # (H, W, 2*Cup)
    # Interleave the two row parities along the leading (row) dim -> folded upsample.
    up_f = jnp.concatenate([row_par[0][:, None], row_par[1][:, None]], axis=1)
    up_f = up_f.reshape(2 * H, W, c2up)                        # (2H, W, 2*Cup), f32

    # ---- 2) assemble z = x_skip + pad(up) into the halo-padded folded scratch ---------
    # Interior occupies rows [1, 1+Hs) and physical columns [8, 8+Wf).
    z_ref[...] = jnp.zeros(z_ref.shape, z_ref.dtype)           # zero halo (and padding)
    if pads == (0, 0, 0, 0):
        # Common case (exercised by the test): single fused store, add done in f32.
        z_ref[1:1 + Hs, 8:8 + Wf, :] = (skip_ref[0] + up_f).astype(cd)
    else:
        # General case, reproducing the module's (quirky) F.pad exactly (see wrapper).
        z_ref[1:1 + Hs, 8:8 + Wf, :] = skip_ref[0].astype(cd)
        r0 = 1 + padtop
        if padleft % 2 == 0:
            u0 = 8 + padleft // 2
            cur = z_ref[r0:r0 + 2 * H, u0:u0 + W, :]
            z_ref[r0:r0 + 2 * H, u0:u0 + W, :] = (
                cur.astype(jnp.float32) + up_f).astype(cd)
        else:
            m = padleft // 2
            cur = z_ref[r0:r0 + 2 * H, 8 + m:8 + m + W, Cup:c2up]
            z_ref[r0:r0 + 2 * H, 8 + m:8 + m + W, Cup:c2up] = (
                cur.astype(jnp.float32) + up_f[:, :, :Cup]).astype(cd)
            cur = z_ref[r0:r0 + 2 * H, 9 + m:9 + m + W, 0:Cup]
            z_ref[r0:r0 + 2 * H, 9 + m:9 + m + W, 0:Cup] = (
                cur.astype(jnp.float32) + up_f[:, :, Cup:]).astype(cd)

    # ---- 3) 3x3 conv == 9 whole-image matmuls over the folded image -------------------
    # (the du=0 / du=2 folded taps are half-zero; they are kept full-width so that no
    #  sub-lane slicing/concat is needed -- the extra MXU work is hidden by the 256^2
    #  array granularity on v6e/v7x and is negligible at these sizes.)
    S = Hs * Wf
    acc = jnp.zeros((S, c2out), jnp.float32)
    for dh in range(3):
        rows = z_ref[dh:dh + Hs]                               # (Hs, Wf+16, 2*Cup)
        for du in range(3):
            win = rows[:, 7 + du:7 + du + Wf, :].reshape(S, c2up)
            acc = acc + jnp.dot(win, wf_ref[dh * 3 + du],      # JIT-loaded weight tap
                                preferred_element_type=jnp.float32)

    # ---- 4) folded (eval-mode) BatchNorm + ReLU epilogue, one lane-dense store --------
    o_ref[0] = jnp.maximum(acc * scale_ref[...] + shift_ref[...], 0.0).astype(o_ref.dtype)


# --------------------------------------------------------------------------------------
# NHWC entry point (no transposes at all: every layout change is a free reshape).
# --------------------------------------------------------------------------------------
def mdp_block_forward_nhwc(x_skip_nhwc, x_nhwc, params, *, compute_dtype=jnp.float32):
    B, H, W, Cin = x_nhwc.shape
    Bs, Hs, Ws, Cup = x_skip_nhwc.shape
    assert Bs == B
    assert Ws % 2 == 0, "skip width must be even for the width-folded layout"
    Cout = params["conv_w"].shape[0]
    assert params["up_w"].shape == (Cin, Cup, 2, 2)
    assert params["conv_w"].shape == (Cout, Cup, 3, 3)

    # Reproduce the module's F.pad(x, [h_pad//2, h_pad-h_pad//2, w_pad//2, w_pad-w_pad//2]):
    # torch pads the LAST dim (width) with the h_pad split and dim -2 (height) with the
    # w_pad split -- exactly as written in the original code (only self-consistent when
    # h_pad == w_pad; same constraint torch itself has at the skip-add).
    h_pad = Hs - 2 * H
    w_pad = Ws - 2 * W
    padtop, padbot = w_pad // 2, w_pad - w_pad // 2      # height axis
    padleft, padright = h_pad // 2, h_pad - h_pad // 2   # width axis
    assert padtop + 2 * H + padbot == Hs and padleft + 2 * W + padright == Ws, (
        "padded upsample does not match x_skip spatial shape")

    Wf = Ws // 2
    f32 = jnp.float32
    cd = compute_dtype

    # --- fold ConvTranspose2d weights: wup[kh][ci, kw*Cup + c] = up_w[ci, c, kh, kw]
    up_w = params["up_w"].astype(f32)
    wup = jnp.stack([jnp.concatenate([up_w[:, :, kh, 0], up_w[:, :, kh, 1]], axis=1)
                     for kh in range(2)])                                  # (2, Cin, 2Cup)
    bup = jnp.concatenate([params["up_b"], params["up_b"]]).astype(f32)[None, :]

    # --- fold Conv2d 3x3 weights into 9 width-folded (2*Cup, 2*Cout) taps
    wc = jnp.transpose(params["conv_w"].astype(f32), (2, 3, 1, 0))         # (3,3,Cup,Cout)
    zero_blk = jnp.zeros((Cup, Cout), f32)

    def _blk(b00, b01, b10, b11):   # rows: input kw blocks, cols: output parity blocks
        return jnp.concatenate([jnp.concatenate([b00, b01], axis=1),
                                jnp.concatenate([b10, b11], axis=1)], axis=0)

    wf = []
    for dh in range(3):
        wf.append(_blk(zero_blk, zero_blk, wc[dh, 0], zero_blk))                 # du = 0
        wf.append(_blk(wc[dh, 1], wc[dh, 0], wc[dh, 2], wc[dh, 1]))              # du = 1
        wf.append(_blk(zero_blk, wc[dh, 2], zero_blk, zero_blk))                 # du = 2
    wf = jnp.stack(wf)                                                     # (9, 2Cup, 2Cout)

    # --- fold conv bias + eval-mode BatchNorm into per-channel scale/shift (f32)
    eps = 1e-5
    scale = params["bn_gamma"] / jnp.sqrt(params["bn_var"] + eps)
    shift = params["bn_beta"] + (params["conv_b"] - params["bn_mean"]) * scale
    scale2 = jnp.concatenate([scale, scale]).astype(f32)[None, :]          # (1, 2Cout)
    shift2 = jnp.concatenate([shift, shift]).astype(f32)[None, :]

    # --- free, contiguity-preserving reshapes into the width-folded layout
    x_in = x_nhwc.reshape(B, H * W, Cin).astype(f32)
    skip_in = x_skip_nhwc.reshape(B, Hs, Wf, 2 * Cup).astype(f32)

    kernel = functools.partial(
        _mdp_fused_kernel, H=H, W=W, Hs=Hs, Wf=Wf, Cup=Cup, Cout=Cout,
        pads=(padtop, padbot, padleft, padright))

    out = pl.pallas_call(
        kernel,
        out_shape=jax.ShapeDtypeStruct((B, Hs * Wf, 2 * Cout), f32),
        grid=(B,),
        in_specs=[
            pl.BlockSpec((1, H * W, Cin), lambda b: (b, 0, 0)),
            pl.BlockSpec((1, Hs, Wf, 2 * Cup), lambda b: (b, 0, 0, 0)),
            pl.BlockSpec((2, Cin, 2 * Cup), lambda b: (0, 0, 0)),
            pl.BlockSpec((1, 2 * Cup), lambda b: (0, 0)),
            pl.BlockSpec((9, 2 * Cup, 2 * Cout), lambda b: (0, 0, 0)),
            pl.BlockSpec((1, 2 * Cout), lambda b: (0, 0)),
            pl.BlockSpec((1, 2 * Cout), lambda b: (0, 0)),
        ],
        out_specs=pl.BlockSpec((1, Hs * Wf, 2 * Cout), lambda b: (b, 0, 0)),
        scratch_shapes=[pltpu.VMEM((Hs + 2, Wf + 16, 2 * Cup), cd)],
        compiler_params=pltpu.CompilerParams(dimension_semantics=("parallel",)),
    )(x_in, skip_in, wup.astype(cd), bup, wf.astype(cd), scale2, shift2)

    # free reshape back: (B, Hs*Wf, 2*Cout) -> (B, Hs, Ws, Cout)
    return out.reshape(B, Hs, Ws, Cout)


# --------------------------------------------------------------------------------------
# Public wrapper with the PyTorch module's NCHW interface (transposes are boundary glue;
# an NHWC pipeline should call mdp_block_forward_nhwc directly and skip them).
# --------------------------------------------------------------------------------------
def mdp_block_forward(x_skip_nchw, x_nchw, params, *, compute_dtype=jnp.float32):
    x_nhwc = jnp.transpose(x_nchw, (0, 2, 3, 1))
    skip_nhwc = jnp.transpose(x_skip_nchw, (0, 2, 3, 1))
    out = mdp_block_forward_nhwc(skip_nhwc, x_nhwc, params, compute_dtype=compute_dtype)
    return jnp.transpose(out, (0, 3, 1, 2))


# --------------------------------------------------------------------------------------
# Pure-JAX reference (mirrors the PyTorch forward, eval-mode BN) for validation.
# --------------------------------------------------------------------------------------
def mdp_block_reference(x_skip, x, params):
    B, Cin, H, W = x.shape
    Cup = params["up_w"].shape[1]
    up = jnp.zeros((B, Cup, 2 * H, 2 * W), jnp.float32)
    for kh in range(2):
        for kw in range(2):
            contrib = jnp.einsum("bchw,cd->bdhw", x, params["up_w"][:, :, kh, kw])
            up = up.at[:, :, kh::2, kw::2].set(contrib)
    up = up + params["up_b"][None, :, None, None]
    h_pad = x_skip.shape[2] - up.shape[2]
    w_pad = x_skip.shape[3] - up.shape[3]
    up = jnp.pad(up, ((0, 0), (0, 0),
                      (w_pad // 2, w_pad - w_pad // 2),
                      (h_pad // 2, h_pad - h_pad // 2)))
    z = x_skip + up
    conv = lax.conv_general_dilated(
        z, params["conv_w"], (1, 1), ((1, 1), (1, 1)),
        dimension_numbers=("NCHW", "OIHW", "NCHW"))
    conv = conv + params["conv_b"][None, :, None, None]
    eps = 1e-5
    bn = (conv - params["bn_mean"][None, :, None, None]) / jnp.sqrt(
        params["bn_var"][None, :, None, None] + eps)
    bn = bn * params["bn_gamma"][None, :, None, None] + params["bn_beta"][None, :, None, None]
    return jnp.maximum(bn, 0.0)


if __name__ == "__main__":
    # Small shapes consistent with the module:
    #   in_channel=4, upsample_channel=8, out_channel=8
    #   x: (2, 4, 8, 8) -> upsampled (2, 8, 16, 16);  x_skip: (2, 8, 16, 16)
    B, Cin, H, W = 2, 4, 8, 8
    Cup, Cout = 8, 8

    key = jax.random.PRNGKey(0)
    ks = jax.random.split(key, 10)
    x = jax.random.normal(ks[0], (B, Cin, H, W), jnp.float32)
    x_skip = jax.random.normal(ks[1], (B, Cup, 2 * H, 2 * W), jnp.float32)

    params = {
        "up_w": 0.2 * jax.random.normal(ks[2], (Cin, Cup, 2, 2), jnp.float32),
        "up_b": 0.1 * jax.random.normal(ks[3], (Cup,), jnp.float32),
        "conv_w": 0.1 * jax.random.normal(ks[4], (Cout, Cup, 3, 3), jnp.float32),
        "conv_b": 0.1 * jax.random.normal(ks[5], (Cout,), jnp.float32),
        "bn_gamma": 0.5 + jax.random.uniform(ks[6], (Cout,), jnp.float32),
        "bn_beta": 0.1 * jax.random.normal(ks[7], (Cout,), jnp.float32),
        "bn_mean": 0.1 * jax.random.normal(ks[8], (Cout,), jnp.float32),
        "bn_var": 0.5 + jax.random.uniform(ks[9], (Cout,), jnp.float32),
    }

    fwd = jax.jit(mdp_block_forward)
    out = jax.block_until_ready(fwd(x_skip, x, params))

    ref = jax.block_until_ready(mdp_block_reference(x_skip, x, params))
    max_err = float(jnp.max(jnp.abs(out - ref)))
    assert out.shape == (B, Cout, 2 * H, 2 * W), out.shape
    assert max_err < 1e-3, f"max abs error too large: {max_err}"

    print("KERNEL_OK")
</pallas_src>

<mosaic_0001>
module attributes {stable_mosaic.version = 11 : i64} {
  func.func @_mdp_fused_kernel(%arg0: i32, %arg1: memref<1x64x4xf32, #tpu.memory_space<vmem>>, %arg2: memref<1x16x8x16xf32, #tpu.memory_space<vmem>>, %arg3: memref<2x4x16xf32, #tpu.memory_space<vmem>>, %arg4: memref<1x16xf32, #tpu.memory_space<vmem>>, %arg5: memref<9x16x16xf32, #tpu.memory_space<vmem>>, %arg6: memref<1x16xf32, #tpu.memory_space<vmem>>, %arg7: memref<1x16xf32, #tpu.memory_space<vmem>>, %arg8: memref<1x128x16xf32, #tpu.memory_space<vmem>>, %arg9: memref<18x24x16xf32, #tpu.memory_space<vmem>>) attributes {dimension_semantics = [#tpu.dimension_semantics<parallel>], iteration_bounds = array<i64: 2>, scalar_prefetch = 0 : i64, scratch_operands = 1 : i64, tpu.core_type = #tpu.core_type<tc>, window_params = [{transform_indices = @transform_0, window_bounds = array<i64: 1, 64, 4>}, {transform_indices = @transform_1, window_bounds = array<i64: 1, 16, 8, 16>}, {pipeline_mode = #tpu.pipeline_mode<synchronous>, transform_indices = @transform_2, window_bounds = array<i64: 2, 4, 16>}, {pipeline_mode = #tpu.pipeline_mode<synchronous>, transform_indices = @transform_3, window_bounds = array<i64: 1, 16>}, {pipeline_mode = #tpu.pipeline_mode<synchronous>, transform_indices = @transform_4, window_bounds = array<i64: 9, 16, 16>}, {pipeline_mode = #tpu.pipeline_mode<synchronous>, transform_indices = @transform_5, window_bounds = array<i64: 1, 16>}, {pipeline_mode = #tpu.pipeline_mode<synchronous>, transform_indices = @transform_6, window_bounds = array<i64: 1, 16>}, {transform_indices = @transform_7, window_bounds = array<i64: 1, 128, 16>}]} {
    %c0 = arith.constant 0 : index
    %c0_0 = arith.constant 0 : index
    %c0_1 = arith.constant 0 : index
    %0 = vector.load %arg1[%c0, %c0_0, %c0_1] : memref<1x64x4xf32, #tpu.memory_space<vmem>>, vector<1x64x4xf32>
    %1 = vector.shape_cast %0 : vector<1x64x4xf32> to vector<64x4xf32>
    %c0_2 = arith.constant 0 : index
    %c0_3 = arith.constant 0 : index
    %2 = vector.load %arg4[%c0_2, %c0_3] : memref<1x16xf32, #tpu.memory_space<vmem>>, vector<1x16xf32>
    %c0_4 = arith.constant 0 : index
    %c0_5 = arith.constant 0 : index
    %c0_6 = arith.constant 0 : index
    %3 = vector.load %arg3[%c0_4, %c0_5, %c0_6] : memref<2x4x16xf32, #tpu.memory_space<vmem>>, vector<1x4x16xf32>
    %4 = vector.shape_cast %3 : vector<1x4x16xf32> to vector<4x16xf32>
    %cst = arith.constant dense<0.000000e+00> : vector<64x16xf32>
    %5 = tpu.matmul %1, %4, %cst {dimension_numbers = #tpu.dot_dimension_numbers<[1], [0], [0], [1], [0, 0, 1, 1], [], []>} : vector<64x4xf32>, vector<4x16xf32>, vector<64x16xf32> -> vector<64x16xf32>
    %6 = vector.broadcast %2 : vector<1x16xf32> to vector<64x16xf32>
    %7 = arith.addf %5, %6 : vector<64x16xf32>
    %8 = vector.shape_cast %7 : vector<64x16xf32> to vector<8x8x16xf32>
    %c1 = arith.constant 1 : index
    %c0_7 = arith.constant 0 : index
    %c0_8 = arith.constant 0 : index
    %9 = vector.load %arg3[%c1, %c0_7, %c0_8] : memref<2x4x16xf32, #tpu.memory_space<vmem>>, vector<1x4x16xf32>
    %10 = vector.shape_cast %9 : vector<1x4x16xf32> to vector<4x16xf32>
    %cst_9 = arith.constant dense<0.000000e+00> : vector<64x16xf32>
    %11 = tpu.matmul %1, %10, %cst_9 {dimension_numbers = #tpu.dot_dimension_numbers<[1], [0], [0], [1], [0, 0, 1, 1], [], []>} : vector<64x4xf32>, vector<4x16xf32>, vector<64x16xf32> -> vector<64x16xf32>
    %12 = vector.broadcast %2 : vector<1x16xf32> to vector<64x16xf32>
    %13 = arith.addf %11, %12 : vector<64x16xf32>
    %14 = vector.shape_cast %13 : vector<64x16xf32> to vector<8x8x16xf32>
    %15 = vector.shape_cast %8 : vector<8x8x16xf32> to vector<8x1x8x16xf32>
    %16 = vector.shape_cast %14 : vector<8x8x16xf32> to vector<8x1x8x16xf32>
    %17 = tpu.concatenate %15, %16 in 1 : vector<8x1x8x16xf32>, vector<8x1x8x16xf32> -> vector<8x2x8x16xf32>
    %18 = vector.shape_cast %17 : vector<8x2x8x16xf32> to vector<16x8x16xf32>
    %cst_10 = arith.constant 0.000000e+00 : f32
    %19 = vector.broadcast %cst_10 : f32 to vector<18x24x16xf32>
    %c0_11 = arith.constant 0 : index
    %c0_12 = arith.constant 0 : index
    %c0_13 = arith.constant 0 : index
    %20 = vector.load %arg9[%c0_11, %c0_12, %c0_13] : memref<18x24x16xf32, #tpu.memory_space<vmem>>, vector<18x24x16xf32>
    tpu.vector_store %arg9[%c0_11, %c0_12, %c0_13], %19 {strides = array<i32>} : memref<18x24x16xf32, #tpu.memory_space<vmem>>, vector<18x24x16xf32>,
    %c0_14 = arith.constant 0 : index
    %c0_15 = arith.constant 0 : index
    %c0_16 = arith.constant 0 : index
    %c0_17 = arith.constant 0 : index
    %21 = vector.load %arg2[%c0_14, %c0_15, %c0_16, %c0_17] : memref<1x16x8x16xf32, #tpu.memory_space<vmem>>, vector<1x16x8x16xf32>
    %22 = vector.shape_cast %21 : vector<1x16x8x16xf32> to vector<16x8x16xf32>
    %23 = arith.addf %22, %18 : vector<16x8x16xf32>
    %c1_18 = arith.constant 1 : index
    %c8 = arith.constant 8 : index
    %c0_19 = arith.constant 0 : index
    %24 = vector.load %arg9[%c1_18, %c8, %c0_19] : memref<18x24x16xf32, #tpu.memory_space<vmem>>, vector<16x8x16xf32>
    tpu.vector_store %arg9[%c1_18, %c8, %c0_19], %23 {strides = array<i32>} : memref<18x24x16xf32, #tpu.memory_space<vmem>>, vector<16x8x16xf32>,
    %cst_20 = arith.constant 0.000000e+00 : f32
    %25 = vector.broadcast %cst_20 : f32 to vector<128x16xf32>
    %c0_21 = arith.constant 0 : index
    %c0_22 = arith.constant 0 : index
    %c0_23 = arith.constant 0 : index
    %26 = vector.load %arg9[%c0_21, %c0_22, %c0_23] : memref<18x24x16xf32, #tpu.memory_space<vmem>>, vector<16x24x16xf32>
    %27 = vector.extract_strided_slice %26 {offsets = [0, 7, 0], sizes = [16, 8, 16], strides = [1, 1, 1]} : vector<16x24x16xf32> to vector<16x8x16xf32>
    %28 = vector.shape_cast %27 : vector<16x8x16xf32> to vector<128x16xf32>
    %c0_24 = arith.constant 0 : index
    %c0_25 = arith.constant 0 : index
    %c0_26 = arith.constant 0 : index
    %29 = vector.load %arg5[%c0_24, %c0_25, %c0_26] : memref<9x16x16xf32, #tpu.memory_space<vmem>>, vector<1x16x16xf32>
    %30 = vector.shape_cast %29 : vector<1x16x16xf32> to vector<16x16xf32>
    %cst_27 = arith.constant dense<0.000000e+00> : vector<128x16xf32>
    %31 = tpu.matmul %28, %30, %cst_27 {dimension_numbers = #tpu.dot_dimension_numbers<[1], [0], [0], [1], [0, 0, 1, 1], [], []>} : vector<128x16xf32>, vector<16x16xf32>, vector<128x16xf32> -> vector<128x16xf32>
    %32 = arith.addf %25, %31 : vector<128x16xf32>
    %33 = vector.extract_strided_slice %26 {offsets = [0, 8, 0], sizes = [16, 8, 16], strides = [1, 1, 1]} : vector<16x24x16xf32> to vector<16x8x16xf32>
    %34 = vector.shape_cast %33 : vector<16x8x16xf32> to vector<128x16xf32>
    %c1_28 = arith.constant 1 : index
    %c0_29 = arith.constant 0 : index
    %c0_30 = arith.constant 0 : index
    %35 = vector.load %arg5[%c1_28, %c0_29, %c0_30] : memref<9x16x16xf32, #tpu.memory_space<vmem>>, vector<1x16x16xf32>
    %36 = vector.shape_cast %35 : vector<1x16x16xf32> to vector<16x16xf32>
    %cst_31 = arith.constant dense<0.000000e+00> : vector<128x16xf32>
    %37 = tpu.matmul %34, %36, %cst_31 {dimension_numbers = #tpu.dot_dimension_numbers<[1], [0], [0], [1], [0, 0, 1, 1], [], []>} : vector<128x16xf32>, vector<16x16xf32>, vector<128x16xf32> -> vector<128x16xf32>
    %38 = arith.addf %32, %37 : vector<128x16xf32>
    %39 = vector.extract_strided_slice %26 {offsets = [0, 9, 0], sizes = [16, 8, 16], strides = [1, 1, 1]} : vector<16x24x16xf32> to vector<16x8x16xf32>
    %40 = vector.shape_cast %39 : vector<16x8x16xf32> to vector<128x16xf32>
    %c2 = arith.constant 2 : index
    %c0_32 = arith.constant 0 : index
    %c0_33 = arith.constant 0 : index
    %41 = vector.load %arg5[%c2, %c0_32, %c0_33] : memref<9x16x16xf32, #tpu.memory_space<vmem>>, vector<1x16x16xf32>
    %42 = vector.shape_cast %41 : vector<1x16x16xf32> to vector<16x16xf32>
    %cst_34 = arith.constant dense<0.000000e+00> : vector<128x16xf32>
    %43 = tpu.matmul %40, %42, %cst_34 {dimension_numbers = #tpu.dot_dimension_numbers<[1], [0], [0], [1], [0, 0, 1, 1], [], []>} : vector<128x16xf32>, vector<16x16xf32>, vector<128x16xf32> -> vector<128x16xf32>
    %44 = arith.addf %38, %43 : vector<128x16xf32>
    %c1_35 = arith.constant 1 : index
    %c0_36 = arith.constant 0 : index
    %c0_37 = arith.constant 0 : index
    %45 = vector.load %arg9[%c1_35, %c0_36, %c0_37] : memref<18x24x16xf32, #tpu.memory_space<vmem>>, vector<16x24x16xf32>
    %46 = vector.extract_strided_slice %45 {offsets = [0, 7, 0], sizes = [16, 8, 16], strides = [1, 1, 1]} : vector<16x24x16xf32> to vector<16x8x16xf32>
    %47 = vector.shape_cast %46 : vector<16x8x16xf32> to vector<128x16xf32>
    %c3 = arith.constant 3 : index
    %c0_38 = arith.constant 0 : index
    %c0_39 = arith.constant 0 : index
    %48 = vector.load %arg5[%c3, %c0_38, %c0_39] : memref<9x16x16xf32, #tpu.memory_space<vmem>>, vector<1x16x16xf32>
    %49 = vector.shape_cast %48 : vector<1x16x16xf32> to vector<16x16xf32>
    %cst_40 = arith.constant dense<0.000000e+00> : vector<128x16xf32>
    %50 = tpu.matmul %47, %49, %cst_40 {dimension_numbers = #tpu.dot_dimension_numbers<[1], [0], [0], [1], [0, 0, 1, 1], [], []>} : vector<128x16xf32>, vector<16x16xf32>, vector<128x16xf32> -> vector<128x16xf32>
    %51 = arith.addf %44, %50 : vector<128x16xf32>
    %52 = vector.extract_strided_slice %45 {offsets = [0, 8, 0], sizes = [16, 8, 16], strides = [1, 1, 1]} : vector<16x24x16xf32> to vector<16x8x16xf32>
    %53 = vector.shape_cast %52 : vector<16x8x16xf32> to vector<128x16xf32>
    %c4 = arith.constant 4 : index
    %c0_41 = arith.constant 0 : index
    %c0_42 = arith.constant 0 : index
    %54 = vector.load %arg5[%c4, %c0_41, %c0_42] : memref<9x16x16xf32, #tpu.memory_space<vmem>>, vector<1x16x16xf32>
    %55 = vector.shape_cast %54 : vector<1x16x16xf32> to vector<16x16xf32>
    %cst_43 = arith.constant dense<0.000000e+00> : vector<128x16xf32>
    %56 = tpu.matmul %53, %55, %cst_43 {dimension_numbers = #tpu.dot_dimension_numbers<[1], [0], [0], [1], [0, 0, 1, 1], [], []>} : vector<128x16xf32>, vector<16x16xf32>, vector<128x16xf32> -> vector<128x16xf32>
    %57 = arith.addf %51, %56 : vector<128x16xf32>
    %58 = vector.extract_strided_slice %45 {offsets = [0, 9, 0], sizes = [16, 8, 16], strides = [1, 1, 1]} : vector<16x24x16xf32> to vector<16x8x16xf32>
    %59 = vector.shape_cast %58 : vector<16x8x16xf32> to vector<128x16xf32>
    %c5 = arith.constant 5 : index
    %c0_44 = arith.constant 0 : index
    %c0_45 = arith.constant 0 : index
    %60 = vector.load %arg5[%c5, %c0_44, %c0_45] : memref<9x16x16xf32, #tpu.memory_space<vmem>>, vector<1x16x16xf32>
    %61 = vector.shape_cast %60 : vector<1x16x16xf32> to vector<16x16xf32>
    %cst_46 = arith.constant dense<0.000000e+00> : vector<128x16xf32>
    %62 = tpu.matmul %59, %61, %cst_46 {dimension_numbers = #tpu.dot_dimension_numbers<[1], [0], [0], [1], [0, 0, 1, 1], [], []>} : vector<128x16xf32>, vector<16x16xf32>, vector<128x16xf32> -> vector<128x16xf32>
    %63 = arith.addf %57, %62 : vector<128x16xf32>
    %c2_47 = arith.constant 2 : index
    %c0_48 = arith.constant 0 : index
    %c0_49 = arith.constant 0 : index
    %64 = vector.load %arg9[%c2_47, %c0_48, %c0_49] : memref<18x24x16xf32, #tpu.memory_space<vmem>>, vector<16x24x16xf32>
    %65 = vector.extract_strided_slice %64 {offsets = [0, 7, 0], sizes = [16, 8, 16], strides = [1, 1, 1]} : vector<16x24x16xf32> to vector<16x8x16xf32>
    %66 = vector.shape_cast %65 : vector<16x8x16xf32> to vector<128x16xf32>
    %c6 = arith.constant 6 : index
    %c0_50 = arith.constant 0 : index
    %c0_51 = arith.constant 0 : index
    %67 = vector.load %arg5[%c6, %c0_50, %c0_51] : memref<9x16x16xf32, #tpu.memory_space<vmem>>, vector<1x16x16xf32>
    %68 = vector.shape_cast %67 : vector<1x16x16xf32> to vector<16x16xf32>
    %cst_52 = arith.constant dense<0.000000e+00> : vector<128x16xf32>
    %69 = tpu.matmul %66, %68, %cst_52 {dimension_numbers = #tpu.dot_dimension_numbers<[1], [0], [0], [1], [0, 0, 1, 1], [], []>} : vector<128x16xf32>, vector<16x16xf32>, vector<128x16xf32> -> vector<128x16xf32>
    %70 = arith.addf %63, %69 : vector<128x16xf32>
    %71 = vector.extract_strided_slice %64 {offsets = [0, 8, 0], sizes = [16, 8, 16], strides = [1, 1, 1]} : vector<16x24x16xf32> to vector<16x8x16xf32>
    %72 = vector.shape_cast %71 : vector<16x8x16xf32> to vector<128x16xf32>
    %c7 = arith.constant 7 : index
    %c0_53 = arith.constant 0 : index
    %c0_54 = arith.constant 0 : index
    %73 = vector.load %arg5[%c7, %c0_53, %c0_54] : memref<9x16x16xf32, #tpu.memory_space<vmem>>, vector<1x16x16xf32>
    %74 = vector.shape_cast %73 : vector<1x16x16xf32> to vector<16x16xf32>
    %cst_55 = arith.constant dense<0.000000e+00> : vector<128x16xf32>
    %75 = tpu.matmul %72, %74, %cst_55 {dimension_numbers = #tpu.dot_dimension_numbers<[1], [0], [0], [1], [0, 0, 1, 1], [], []>} : vector<128x16xf32>, vector<16x16xf32>, vector<128x16xf32> -> vector<128x16xf32>
    %76 = arith.addf %70, %75 : vector<128x16xf32>
    %77 = vector.extract_strided_slice %64 {offsets = [0, 9, 0], sizes = [16, 8, 16], strides = [1, 1, 1]} : vector<16x24x16xf32> to vector<16x8x16xf32>
    %78 = vector.shape_cast %77 : vector<16x8x16xf32> to vector<128x16xf32>
    %c8_56 = arith.constant 8 : index
    %c0_57 = arith.constant 0 : index
    %c0_58 = arith.constant 0 : index
    %79 = vector.load %arg5[%c8_56, %c0_57, %c0_58] : memref<9x16x16xf32, #tpu.memory_space<vmem>>, vector<1x16x16xf32>
    %80 = vector.shape_cast %79 : vector<1x16x16xf32> to vector<16x16xf32>
    %cst_59 = arith.constant dense<0.000000e+00> : vector<128x16xf32>
    %81 = tpu.matmul %78, %80, %cst_59 {dimension_numbers = #tpu.dot_dimension_numbers<[1], [0], [0], [1], [0, 0, 1, 1], [], []>} : vector<128x16xf32>, vector<16x16xf32>, vector<128x16xf32> -> vector<128x16xf32>
    %82 = arith.addf %76, %81 : vector<128x16xf32>
    %c0_60 = arith.constant 0 : index
    %c0_61 = arith.constant 0 : index
    %83 = vector.load %arg6[%c0_60, %c0_61] : memref<1x16xf32, #tpu.memory_space<vmem>>, vector<1x16xf32>
    %84 = vector.broadcast %83 : vector<1x16xf32> to vector<128x16xf32>
    %85 = arith.mulf %82, %84 : vector<128x16xf32>
    %c0_62 = arith.constant 0 : index
    %c0_63 = arith.constant 0 : index
    %86 = vector.load %arg7[%c0_62, %c0_63] : memref<1x16xf32, #tpu.memory_space<vmem>>, vector<1x16xf32>
    %87 = vector.broadcast %86 : vector<1x16xf32> to vector<128x16xf32>
    %88 = arith.addf %85, %87 : vector<128x16xf32>
    %cst_64 = arith.constant 0.000000e+00 : f32
    %89 = vector.broadcast %cst_64 : f32 to vector<128x16xf32>
    %90 = arith.maximumf %88, %89 : vector<128x16xf32>
    %c0_65 = arith.constant 0 : index
    %c0_66 = arith.constant 0 : index
    %c0_67 = arith.constant 0 : index
    %91 = vector.load %arg8[%c0_65, %c0_66, %c0_67] : memref<1x128x16xf32, #tpu.memory_space<vmem>>, vector<1x128x16xf32>
    %92 = vector.shape_cast %91 : vector<1x128x16xf32> to vector<128x16xf32>
    %93 = vector.shape_cast %90 : vector<128x16xf32> to vector<1x128x16xf32>
    tpu.vector_store %arg8[%c0_65, %c0_66, %c0_67], %93 {strides = array<i32>} : memref<1x128x16xf32, #tpu.memory_space<vmem>>, vector<1x128x16xf32>,
    return
  }
  func.func @transform_0(%arg0: i32) -> (i32, i32, i32) {
    %c0_i32 = arith.constant 0 : i32
    %c0_i32_0 = arith.constant 0 : i32
    %c0_i32_1 = arith.constant 0 : i32
    return %arg0, %c0_i32, %c0_i32_0 : i32, i32, i32
  }
  func.func @transform_1(%arg0: i32) -> (i32, i32, i32, i32) {
    %c0_i32 = arith.constant 0 : i32
    %c0_i32_0 = arith.constant 0 : i32
    %c0_i32_1 = arith.constant 0 : i32
    %c0_i32_2 = arith.constant 0 : i32
    return %arg0, %c0_i32, %c0_i32_0, %c0_i32_1 : i32, i32, i32, i32
  }
  func.func @transform_2(%arg0: i32) -> (i32, i32, i32) {
    %c0_i32 = arith.constant 0 : i32
    %c0_i32_0 = arith.constant 0 : i32
    %c0_i32_1 = arith.constant 0 : i32
    %c0_i32_2 = arith.constant 0 : i32
    return %c0_i32, %c0_i32_0, %c0_i32_1 : i32, i32, i32
  }
  func.func @transform_3(%arg0: i32) -> (i32, i32) {
    %c0_i32 = arith.constant 0 : i32
    %c0_i32_0 = arith.constant 0 : i32
    %c0_i32_1 = arith.constant 0 : i32
    return %c0_i32, %c0_i32_0 : i32, i32
  }
  func.func @transform_4(%arg0: i32) -> (i32, i32, i32) {
    %c0_i32 = arith.constant 0 : i32
    %c0_i32_0 = arith.constant 0 : i32
    %c0_i32_1 = arith.constant 0 : i32
    %c0_i32_2 = arith.constant 0 : i32
    return %c0_i32, %c0_i32_0, %c0_i32_1 : i32, i32, i32
  }
  func.func @transform_5(%arg0: i32) -> (i32, i32) {
    %c0_i32 = arith.constant 0 : i32
    %c0_i32_0 = arith.constant 0 : i32
    %c0_i32_1 = arith.constant 0 : i32
    return %c0_i32, %c0_i32_0 : i32, i32
  }
  func.func @transform_6(%arg0: i32) -> (i32, i32) {
    %c0_i32 = arith.constant 0 : i32
    %c0_i32_0 = arith.constant 0 : i32
    %c0_i32_1 = arith.constant 0 : i32
    return %c0_i32, %c0_i32_0 : i32, i32
  }
  func.func @transform_7(%arg0: i32) -> (i32, i32, i32) {
    %c0_i32 = arith.constant 0 : i32
    %c0_i32_0 = arith.constant 0 : i32
    %c0_i32_1 = arith.constant 0 : i32
    return %arg0, %c0_i32, %c0_i32_0 : i32, i32, i32
  }
}

</mosaic_0001>

<bundles_post_ra>
// kernel: mdp_block_forward.1
= control target key start
LH: loop header
LB: loop body
LE: loop exit
PB: predicated region body
PF: predicated region fallthrough
CT: control target
= control target key end

     0   :  { %s3838_s24 = smov 0   ;;  %s4789_s0 = inlined_call_operand.vmem [shape: f32[2,64,4], index: 0, kind: input, shape index: {}]   ;;  %s4790_s1 = inlined_call_operand.vmem [shape: f32[2,16,8,16], index: 1, kind: input, shape index: {}]   ;;  %s4791_s2 = inlined_call_operand.vmem [shape: f32[2,4,16], index: 2, kind: input, shape index: {}]   ;;  %s4792_s3 = inlined_call_operand.vmem [shape: f32[1,16], index: 3, kind: input, shape index: {}]   ;;  %s4793_s4 = inlined_call_operand.vmem [shape: f32[9,16,16], index: 4, kind: input, shape index: {}]   ;;  %s4794_s5 = inlined_call_operand.vmem [shape: f32[1,16], index: 5, kind: input, shape index: {}]   ;;  %s4795_s6 = inlined_call_operand.vmem [shape: f32[1,16], index: 6, kind: input, shape index: {}]   ;;  %s4796_s7 = inlined_call_operand.vmem [shape: f32[2,128,16], index: 7, kind: output, shape index: {}]  }
   0x1 LB: > { %s3118_s25 = sadd.s32 4294967295, %s3795_s24   ;;  %p3122_p0 = scmp.ge.s32.totalorder %s3795_s24, 1  ;;  %s3795_s24 = sphi %s3838_s24, %s17_s24  }
   0x2   : > { %p247_p1 = scmp.lt.s32.totalorder %s3795_s24, 3 }
   0x4   : > { %p248_p2 = pnand %p3122_p0, %p247_p1 }
   0x6   : > { %251 = sbr.rel (%p248_p2) target bundleno = 579 (0x243), region = 48 }
   0xb   : > { %v308_v0 = vld [vmem:[%s4791_s2] sm:$0xf]  ;;  %vm340_vm0 = vcmask 1043456   ;;  %p284_p3 = scmp.lt.s32.totalorder %s3118_s25, 1  ;;  %v3139_v1 = vld [vmem:[%s4791_s2 + $0x4] sm:$0xf] }
   0xc   : > { %3496 = vmatprep.subr.msk.mxu0 %vm340_vm0, %v308_v0  ;;  %3510 = vmatprep.subr.msk.mxu1 %vm340_vm0, %v3139_v1  ;;  %vm315_vm1 = vcmask 31744   ;;  %vm559_vm2 = vcmask 130048   ;;  %v3797_v10 = vmov 0.0   ;;  %v3150_v11 = vld [vmem:[%s4793_s4 + $0x18] sm:$0xff]  ;;  %v3149_v12 = vld [vmem:[%s4793_s4 + $0x10] sm:$0xff]  ;;  %v3941_v14 = vld [vmem:[%s4793_s4 + $0x8] sm:$0xff] }
   0xd   : > { %3497 = vmatpush3.msk.msra.mxu0 %vm340_vm0, %v308_v0  ;;  %s4846_s25 = smov (!%p284_p3, %s3118_s25), 1  ;;  %3511 = vmatpush3.msk.msra.mxu1 %vm340_vm0, %v3139_v1  ;;  %570 = vst.msk [vmem:[#allocation2 + $0x50] sm:$0xff] %vm559_vm2, %v3797_v10  ;;  %560 = vst.msk [vmem:[#allocation2] sm:$0xff] %vm559_vm2, %v3797_v10  ;;  %v3947_v15 = vld [vmem:[%s4793_s4 + $0x28] sm:$0xff]  ;;  %v3961_v16 = vld [vmem:[%s4792_s3] ss:$0 sm:$0xff] }
   0xe   : > { %s3313_s30 = sshll.u32 %s4846_s25, 6  ;;  %561 = vst.msk [vmem:[#allocation2 + $0x8] sm:$0xff] %vm559_vm2, %v3797_v10  ;;  %562 = vst.msk [vmem:[#allocation2 + $0x10] sm:$0xff] %vm559_vm2, %v3797_v10  ;;  %3776 = vmatprep.subr.mxu1 %v3150_v11  ;;  %3524 = vmatprep.subr.mxu0 %v3150_v11  ;;  %s3314_s19 = sshll.u32 %s4846_s25, 7  ;;  %vm1167_vm3 = vcmask 1046528   ;;  %vm743_vm4 = vcmask 1040384  }
   0xf   : > { %s288_s10 = scalar_lea.vmem %s4789_s0, %s3313_s30  ;;  %563 = vst.msk [vmem:[#allocation2 + $0x18] sm:$0xff] %vm559_vm2, %v3797_v10  ;;  %564 = vst.msk [vmem:[#allocation2 + $0x20] sm:$0xff] %vm559_vm2, %v3797_v10  ;;  %s3956_s22 = scalar_lea.vmem %s4790_s1, %s3314_s19 }
  0x10   : > { %v299_v2 = vld [vmem:[%s288_s10] sm:$0xff]  ;;  %v300_v3 = vld [vmem:[%s288_s10 + $0x8] sm:$0xff]  ;;  %v301_v4 = vld [vmem:[%s288_s10 + $0x10] sm:$0xff]  ;;  %565 = vst.msk [vmem:[#allocation2 + $0x28] sm:$0xff] %vm559_vm2, %v3797_v10  ;;  %s4691_s18 = scalar_lea.vmem %s4796_s7, %s3314_s19 }
  0x11   : > { %3498 = vmatprep.mubr.msk.f32.mxu0 %vm315_vm1, %v299_v2  ;;  %3512 = vmatprep.mubr.msk.f32.mxu1 %vm315_vm1, %v299_v2  ;;  %v302_v5 = vld [vmem:[%s288_s10 + $0x18] sm:$0xff]  ;;  %v303_v6 = vld [vmem:[%s288_s10 + $0x20] sm:$0xff]  ;;  %v304_v7 = vld [vmem:[%s288_s10 + $0x28] sm:$0xff]  ;;  %566 = vst.msk [vmem:[#allocation2 + $0x30] sm:$0xff] %vm559_vm2, %v3797_v10 }
  0x12   : > { %3499 = vmatmul.mubr.msk.f32.vlgmr.msra.gmra.mxu0 %vm315_vm1, %v300_v3  ;;  %3513 = vmatmul.mubr.msk.f32.vlgmr.msra.gmra.mxu1 %vm315_vm1, %v300_v3  ;;  %v305_v8 = vld [vmem:[%s288_s10 + $0x30] sm:$0xff]  ;;  %v306_v9 = vld [vmem:[%s288_s10 + $0x38] sm:$0xff]  ;;  %567 = vst.msk [vmem:[#allocation2 + $0x38] sm:$0xff] %vm559_vm2, %v3797_v10  ;;  %568 = vst.msk [vmem:[#allocation2 + $0x40] sm:$0xff] %vm559_vm2, %v3797_v10 }
  0x13   : > { %3501 = vmatprep.mubr.msk.f32.mxu0 %vm315_vm1, %v301_v4  ;;  %3515 = vmatprep.mubr.msk.f32.mxu1 %vm315_vm1, %v301_v4  ;;  %569 = vst.msk [vmem:[#allocation2 + $0x48] sm:$0xff] %vm559_vm2, %v3797_v10  ;;  %571 = vst.msk [vmem:[#allocation2 + $0x58] sm:$0xff] %vm559_vm2, %v3797_v10  ;;  %v616_v18 = vld [vmem:[%s3956_s22 + $0x10] sm:$0xff]  ;;  %v617_v20 = vld [vmem:[%s3956_s22 + $0x18] sm:$0xff] }
  0x14   : > { %572 = vst.msk [vmem:[#allocation2 + $0x60] sm:$0xff] %vm559_vm2, %v3797_v10  ;;  %573 = vst.msk [vmem:[#allocation2 + $0x68] sm:$0xff] %vm559_vm2, %v3797_v10  ;;  %3778 = vmatpush3.msra.mxu1 %v3150_v11  ;;  %3525 = vmatpush3.msra.mxu0 %v3150_v11  ;;  %v614_v24 = vld [vmem:[%s3956_s22] sm:$0xff]  ;;  %v615_v26 = vld [vmem:[%s3956_s22 + $0x8] sm:$0xff] }
  0x15   : > { %574 = vst.msk [vmem:[#allocation2 + $0x70] sm:$0xff] %vm559_vm2, %v3797_v10  ;;  %575 = vst.msk [vmem:[#allocation2 + $0x78] sm:$0xff] %vm559_vm2, %v3797_v10  ;;  %3526 = vmatprep.subr.mxu0 %v3149_v12  ;;  %3777 = vmatprep.subr.mxu1 %v3149_v12  ;;  %v3934_v13 = vld [vmem:[#allocation2 + $0x8] sm:$0xff]  ;;  %v620_v32 = vld [vmem:[%s3956_s22 + $0x30] sm:$0xff] }
  0x16   : > { %3502 = vmatmul.mubr.msk.f32.gmra.mxu0 %vm315_vm1, %v302_v5  ;;  %3516 = vmatmul.mubr.msk.f32.gmra.mxu1 %vm315_vm1, %v302_v5  ;;  %576 = vst.msk [vmem:[#allocation2 + $0x80] sm:$0xff] %vm559_vm2, %v3797_v10  ;;  %577 = vst.msk [vmem:[#allocation2 + $0x88] sm:$0xff] %vm559_vm2, %v3797_v10  ;;  %v621_v34 = vld [vmem:[%s3956_s22 + $0x38] sm:$0xff]  ;;  %v618_v40 = vld [vmem:[%s3956_s22 + $0x20] sm:$0xff] }
  0x17   : > { %3504 = vmatprep.mubr.msk.f32.mxu0 %vm315_vm1, %v303_v6  ;;  %3518 = vmatprep.mubr.msk.f32.mxu1 %vm315_vm1, %v303_v6  ;;  %578 = vst.msk [vmem:[#allocation2 + $0x90] sm:$0xff] %vm559_vm2, %v3797_v10  ;;  %579 = vst.msk [vmem:[#allocation2 + $0x98] sm:$0xff] %vm559_vm2, %v3797_v10  ;;  %v619_v42 = vld [vmem:[%s3956_s22 + $0x28] sm:$0xff]  ;;  %v624_v48 = vld [vmem:[%s3956_s22 + $0x50] sm:$0xff] }
  0x18   : > { %580 = vst.msk [vmem:[#allocation2 + $0xa0] sm:$0xff] %vm559_vm2, %v3797_v10  ;;  %581 = vst.msk [vmem:[#allocation2 + $0xa8] sm:$0xff] %vm559_vm2, %v3797_v10  ;;  %3527 = vmatpush3.msra.mxu0 %v3149_v12  ;;  %3779 = vmatpush3.msra.mxu1 %v3149_v12  ;;  %v625_v50 = vld [vmem:[%s3956_s22 + $0x58] sm:$0xff]  ;;  %v622_v56 = vld [vmem:[%s3956_s22 + $0x40] sm:$0xff] }
  0x19   : > { %582 = vst.msk [vmem:[#allocation2 + $0xb0] sm:$0xff] %vm559_vm2, %v3797_v10  ;;  %583 = vst.msk [vmem:[#allocation2 + $0xb8] sm:$0xff] %vm559_vm2, %v3797_v10  ;;  %3552 = vmatprep.subr.mxu1 %v3941_v14  ;;  %3580 = vmatprep.subr.mxu0 %v3947_v15  ;;  %v623_v58 = vld [vmem:[%s3956_s22 + $0x48] sm:$0xff]  ;;  %v628_v0 = vld [vmem:[%s3956_s22 + $0x70] sm:$0xff] }
  0x1a   : > { %3505 = vmatmul.mubr.msk.f32.gmra.mxu0 %vm315_vm1, %v304_v7  ;;  %3519 = vmatmul.mubr.msk.f32.gmra.mxu1 %vm315_vm1, %v304_v7  ;;  %584 = vst.msk [vmem:[#allocation2 + $0xc0] sm:$0xff] %vm559_vm2, %v3797_v10  ;;  %585 = vst.msk [vmem:[#allocation2 + $0xc8] sm:$0xff] %vm559_vm2, %v3797_v10  ;;  %v626_v5 = vld [vmem:[%s3956_s22 + $0x60] sm:$0xff]  ;;  %v629_v7 = vld [vmem:[%s3956_s22 + $0x78] sm:$0xff] }
  0x1b   : > { %3507 = vmatprep.mubr.msk.f32.mxu0 %vm315_vm1, %v305_v8  ;;  %3521 = vmatprep.mubr.msk.f32.mxu1 %vm315_vm1, %v305_v8  ;;  %586 = vst.msk [vmem:[#allocation2 + $0xd0] sm:$0xff] %vm559_vm2, %v3797_v10  ;;  %587 = vst.msk [vmem:[#allocation2 + $0xd8] sm:$0xff] %vm559_vm2, %v3797_v10  ;;  %v3183_v12 = vld [vmem:[%s4793_s4 + $0x20] sm:$0xff] }
  0x1c   : > { %588 = vst.msk [vmem:[#allocation2 + $0xe0] sm:$0xff] %vm559_vm2, %v3797_v10  ;;  %589 = vst.msk [vmem:[#allocation2 + $0xe8] sm:$0xff] %vm559_vm2, %v3797_v10 }
  0x1d   : > { %590 = vst.msk [vmem:[#allocation2 + $0xf0] sm:$0xff] %vm559_vm2, %v3797_v10  ;;  %591 = vst.msk [vmem:[#allocation2 + $0xf8] sm:$0xff] %vm559_vm2, %v3797_v10 }
  0x1e   : > { %3508 = vmatmul.mubr.msk.f32.gmra.mxu0 %vm315_vm1, %v306_v9  ;;  %3522 = vmatmul.mubr.msk.f32.gmra.mxu1 %vm315_vm1, %v306_v9  ;;  %592 = vst.msk [vmem:[#allocation2 + $0x100] sm:$0xff] %vm559_vm2, %v3797_v10  ;;  %593 = vst.msk [vmem:[#allocation2 + $0x108] sm:$0xff] %vm559_vm2, %v3797_v10 }
  0x1f   : > { %594 = vst.msk [vmem:[#allocation2 + $0x110] sm:$0xff] %vm559_vm2, %v3797_v10  ;;  %595 = vst.msk [vmem:[#allocation2 + $0x118] sm:$0xff] %vm559_vm2, %v3797_v10  ;;  %3528 = vmatprep.mubr.msk.f32.mxu0 %vm559_vm2, %v3934_v13 }
  0x20   : > { %596 = vst.msk [vmem:[#allocation2 + $0x120] sm:$0xff] %vm559_vm2, %v3797_v10  ;;  %597 = vst.msk [vmem:[#allocation2 + $0x128] sm:$0xff] %vm559_vm2, %v3797_v10 }
  0x21   : > { %598 = vst.msk [vmem:[#allocation2 + $0x130] sm:$0xff] %vm559_vm2, %v3797_v10  ;;  %599 = vst.msk [vmem:[#allocation2 + $0x138] sm:$0xff] %vm559_vm2, %v3797_v10 }
  0x22   : > { %600 = vst.msk [vmem:[#allocation2 + $0x140] sm:$0xff] %vm559_vm2, %v3797_v10  ;;  %601 = vst.msk [vmem:[#allocation2 + $0x148] sm:$0xff] %vm559_vm2, %v3797_v10 }
  0x23   : > { %602 = vst.msk [vmem:[#allocation2 + $0x150] sm:$0xff] %vm559_vm2, %v3797_v10  ;;  %603 = vst.msk [vmem:[#allocation2 + $0x158] sm:$0xff] %vm559_vm2, %v3797_v10 }
  0x24   : > { %604 = vst.msk [vmem:[#allocation2 + $0x160] sm:$0xff] %vm559_vm2, %v3797_v10  ;;  %605 = vst.msk [vmem:[#allocation2 + $0x168] sm:$0xff] %vm559_vm2, %v3797_v10 }
  0x25   : > { %606 = vst.msk [vmem:[#allocation2 + $0x170] sm:$0xff] %vm559_vm2, %v3797_v10  ;;  %607 = vst.msk [vmem:[#allocation2 + $0x178] sm:$0xff] %vm559_vm2, %v3797_v10 }
  0x26   : > { %608 = vst.msk [vmem:[#allocation2 + $0x180] sm:$0xff] %vm559_vm2, %v3797_v10  ;;  %609 = vst.msk [vmem:[#allocation2 + $0x188] sm:$0xff] %vm559_vm2, %v3797_v10 }
  0x27   : > { %610 = vst.msk [vmem:[#allocation2 + $0x190] sm:$0xff] %vm559_vm2, %v3797_v10  ;;  %611 = vst.msk [vmem:[#allocation2 + $0x198] sm:$0xff] %vm559_vm2, %v3797_v10 }
  0x28   : > { %612 = vst.msk [vmem:[#allocation2 + $0x1a0] sm:$0xff] %vm559_vm2, %v3797_v10  ;;  %613 = vst.msk [vmem:[#allocation2 + $0x1a8] sm:$0xff] %vm559_vm2, %v3797_v10 }
  0xd2   : > { %v3500_v17 = vpop.f32.mrf.mxu0  ;;  %v3514_v19 = vpop.f32.mrf.mxu1 }
  0xd3   : > { %v416_v21 = vadd.f32 %v3500_v17, %v3961_v16  ;;  %v526_v22 = vadd.f32 %v3514_v19, %v3961_v16  ;;  %v627_v19 = vld [vmem:[%s3956_s22 + $0x68] sm:$0xff] }
  0xd4   : > { %v410_v23 = vpop.f32.mrf.mxu0  ;;  %v520_v25 = vpop.f32.mrf.mxu1 }
  0xd5   : > { %v632_v27 = vadd.f32 %v616_v18, %v416_v21  ;;  %v633_v28 = vadd.f32 %v617_v20, %v526_v22  ;;  %v411_v29 = vadd.f32 %v3961_v16, %v410_v23  ;;  %v521_v30 = vadd.f32 %v3961_v16, %v520_v25  ;;  %v4024_v23 = vld [vmem:[%s4793_s4 + $0x48] sm:$0xff] }
  0xd6   : > { %v3503_v31 = vpop.f32.mrf.mxu0  ;;  %v3517_v33 = vpop.f32.mrf.mxu1 }
  0xd7   : > { %649 = vst.msk [vmem:[#allocation2 + $0x50] sm:$0xff] %vm559_vm2, %v632_v27  ;;  %650 = vst.msk [vmem:[#allocation2 + $0x68] sm:$0xff] %vm559_vm2, %v633_v28  ;;  %v630_v35 = vadd.f32 %v614_v24, %v411_v29  ;;  %v631_v36 = vadd.f32 %v615_v26, %v521_v30  ;;  %v426_v37 = vadd.f32 %v3503_v31, %v3961_v16  ;;  %v665_v26 = vld [vmem:[#allocation2 + $0x10] sm:$0xff]  ;;  %v1168_v27 = vrot.slane %v3934_v13, 1  ;;  %v792_v28 = vld [vmem:[%s4793_s4] sm:$0xff] }
  0xd8   : > { %v536_v38 = vadd.f32 %v3517_v33, %v3961_v16  ;;  %v420_v39 = vpop.f32.mrf.mxu0  ;;  %v530_v41 = vpop.f32.mrf.mxu1  ;;  %v1169_v29 = vrot.slane %v665_v26, 1 }
  0xd9   : > { %647 = vst.msk [vmem:[#allocation2 + $0x20] sm:$0xff] %vm559_vm2, %v630_v35  ;;  %648 = vst.msk [vmem:[#allocation2 + $0x38] sm:$0xff] %vm559_vm2, %v631_v36  ;;  %v636_v43 = vadd.f32 %v620_v32, %v426_v37  ;;  %v421_v45 = vadd.f32 %v3961_v16, %v420_v39  ;;  %v531_v46 = vadd.f32 %v3961_v16, %v530_v41  ;;  %v671_v35 = vld [vmem:[#allocation2 + $0x40] sm:$0xff]  ;;  %v4071_v41 = vld [vmem:[%s4793_s4 + $0x38] sm:$0xff] }
  0xda   : > { %v637_v44 = vadd.f32 %v621_v34, %v536_v38  ;;  %v3506_v47 = vpop.f32.mrf.mxu0  ;;  %v3520_v49 = vpop.f32.mrf.mxu1  ;;  %v668_v34 = vld [vmem:[#allocation2 + $0x28] sm:$0xff]  ;;  %v1170_v36 = vsel %vm1167_vm3, %v1168_v27, %v1169_v29  ;;  %v663_v37 = vld [vmem:[#allocation2] sm:$0xff] }
  0xdb   : > { %653 = vst.msk [vmem:[#allocation2 + $0xb0] sm:$0xff] %vm559_vm2, %v636_v43  ;;  %v634_v51 = vadd.f32 %v618_v40, %v421_v45  ;;  %v635_v52 = vadd.f32 %v619_v42, %v531_v46  ;;  %v436_v53 = vadd.f32 %v3506_v47, %v3961_v16  ;;  %v546_v54 = vadd.f32 %v3520_v49, %v3961_v16  ;;  %v674_v45 = vld [vmem:[#allocation2 + $0x58] sm:$0xff]  ;;  %v677_v46 = vld [vmem:[#allocation2 + $0x70] sm:$0xff] }
  0xdc   : > { %654 = vst.msk [vmem:[#allocation2 + $0xc8] sm:$0xff] %vm559_vm2, %v637_v44  ;;  %v430_v55 = vpop.f32.mrf.mxu0  ;;  %v540_v57 = vpop.f32.mrf.mxu1  ;;  %v1175_v44 = vrot.slane %v671_v35, 1  ;;  %v745_v47 = vrot.slane %v3934_v13, 7  ;;  %v744_v49 = vrot.slane %v663_v37, 7  ;;  %v695_v35 = vld [vmem:[#allocation2 + $0x100] sm:$0xff] }
  0xdd   : > { %651 = vst.msk [vmem:[#allocation2 + $0x80] sm:$0xff] %vm559_vm2, %v634_v51  ;;  %652 = vst.msk [vmem:[#allocation2 + $0x98] sm:$0xff] %vm559_vm2, %v635_v52  ;;  %v640_v59 = vadd.f32 %v624_v48, %v436_v53  ;;  %v641_v60 = vadd.f32 %v625_v50, %v546_v54  ;;  %v431_v61 = vadd.f32 %v3961_v16, %v430_v55  ;;  %v1178_v53 = vrot.slane %v674_v45, 1  ;;  %v666_v54 = vld [vmem:[#allocation2 + $0x18] sm:$0xff] }
  0xde   : > { %v541_v62 = vadd.f32 %v3961_v16, %v540_v57  ;;  %v3509_v63 = vpop.f32.mrf.mxu0  ;;  %v3523_v1 = vpop.f32.mrf.mxu1  ;;  %v680_v57 = vld [vmem:[#allocation2 + $0x88] sm:$0xff] }
  0xdf   : > { %657 = vst.msk [vmem:[#allocation2 + $0x110] sm:$0xff] %vm559_vm2, %v640_v59  ;;  %658 = vst.msk [vmem:[#allocation2 + $0x128] sm:$0xff] %vm559_vm2, %v641_v60  ;;  %v638_v2 = vadd.f32 %v622_v56, %v431_v61  ;;  %v446_v4 = vadd.f32 %v3509_v63, %v3961_v16  ;;  %v556_v6 = vadd.f32 %v3523_v1, %v3961_v16  ;;  %v1181_v56 = vrot.slane %v677_v46, 1  ;;  %v669_v59 = vld [vmem:[#allocation2 + $0x30] sm:$0xff]  ;;  %v672_v63 = vld [vmem:[#allocation2 + $0x48] sm:$0xff] }
  0xe0   : > { %v639_v3 = vadd.f32 %v623_v58, %v541_v62  ;;  %v4002_v8 = vld [vmem:[#allocation2 + $0x20] sm:$0xff]  ;;  %v440_v9 = vpop.f32.mrf.mxu0  ;;  %v4004_v10 = vld [vmem:[#allocation2 + $0x38] sm:$0xff]  ;;  %v550_v11 = vpop.f32.mrf.mxu1  ;;  %v746_v60 = vsel %vm743_vm4, %v744_v49, %v745_v47  ;;  %v747_v61 = vrot.slane %v666_v54, 7  ;;  %v1199_v49 = vrot.slane %v695_v35, 1 }
  0xe1   : > { %655 = vst.msk [vmem:[#allocation2 + $0xe0] sm:$0xff] %vm559_vm2, %v638_v2  ;;  %v644_v17 = vadd.f32 %v628_v0, %v446_v4  ;;  %3529 = vmatmul.mubr.msk.f32.vlgmr.msra.gmra.mxu0 %vm559_vm2, %v4002_v8  ;;  %v441_v18 = vadd.f32 %v3961_v16, %v440_v9  ;;  %v645_v20 = vadd.f32 %v629_v7, %v556_v6  ;;  %v1171_v38 = vrot.slane %v4002_v8, 1  ;;  %v3219_v58 = vld [vmem:[%s4793_s4 + $0x40] sm:$0xff] }
  0xe2   : > { %656 = vst.msk [vmem:[#allocation2 + $0xf8] sm:$0xff] %vm559_vm2, %v639_v3  ;;  %3531 = vmatprep.mubr.msk.f32.mxu0 %vm559_vm2, %v4004_v10  ;;  %v551_v21 = vadd.f32 %v3961_v16, %v550_v11  ;;  %3581 = vmatpush3.msra.mxu0 %v3947_v15  ;;  %v4030_v16 = vld [vmem:[#allocation2 + $0x50] sm:$0xff]  ;;  %v4035_v15 = vld [vmem:[#allocation2 + $0x68] sm:$0xff]  ;;  %v1174_v42 = vrot.slane %v4004_v10, 1  ;;  %v683_v62 = vld [vmem:[#allocation2 + $0xa0] sm:$0xff]  ;;  %v748_v0 = vrot.slane %v4002_v8, 7 }
  0xe3   : > { %v4018_v22 = vld [vmem:[#allocation2 + $0xc8] sm:$0xff]  ;;  %661 = vst.msk [vmem:[#allocation2 + $0x170] sm:$0xff] %vm559_vm2, %v644_v17  ;;  %v642_v24 = vadd.f32 %v626_v5, %v441_v18  ;;  %3582 = vmatprep.subr.mxu0 %v3183_v12  ;;  %662 = vst.msk [vmem:[#allocation2 + $0x188] sm:$0xff] %vm559_vm2, %v645_v20  ;;  %v4064_v39 = vld [vmem:[#allocation2 + $0xb0] sm:$0xff]  ;;  %v1177_v50 = vrot.slane %v4030_v16, 1  ;;  %v1180_v55 = vrot.slane %v4035_v15, 1 }
  0xe4   : > { %3540 = vmatprep.mubr.msk.f32.mxu1 %vm559_vm2, %v4018_v22  ;;  %v643_v25 = vadd.f32 %v627_v19, %v551_v21  ;;  %3583 = vmatpush3.msra.mxu0 %v3183_v12  ;;  %v4045_v30 = vld [vmem:[#allocation2 + $0x80] sm:$0xff]  ;;  %v4055_v33 = vld [vmem:[#allocation2 + $0x98] sm:$0xff]  ;;  %v4099_v13 = vsel %vm1167_vm3, %v1174_v42, %v1175_v44  ;;  %v1184_v4 = vrot.slane %v680_v57, 1  ;;  %v751_v7 = vrot.slane %v4004_v10, 7  ;;  %v4128_v12 = vld [vmem:[%s4793_s4 + $0x68] sm:$0xff] }
  0xe5   : > { %659 = vst.msk [vmem:[#allocation2 + $0x140] sm:$0xff] %vm559_vm2, %v642_v24  ;;  %3532 = vmatmul.mubr.msk.f32.gmra.mxu0 %vm559_vm2, %v4030_v16  ;;  %3636 = vmatprep.subr.mxu0 %v4024_v23  ;;  %v1183_v1 = vrot.slane %v4045_v30, 1  ;;  %v4115_v3 = vsel %vm1167_vm3, %v1177_v50, %v1178_v53  ;;  %v686_v5 = vld [vmem:[#allocation2 + $0xb8] sm:$0xff]  ;;  %v675_v6 = vld [vmem:[#allocation2 + $0x60] sm:$0xff]  ;;  %v4123_v9 = vsel %vm1167_vm3, %v1180_v55, %v1181_v56  ;;  %v750_v11 = vrot.slane %v669_v59, 7  ;;  %v689_v19 = vld [vmem:[#allocation2 + $0xd0] sm:$0xff] }
  0xe6   : > { %660 = vst.msk [vmem:[#allocation2 + $0x158] sm:$0xff] %vm559_vm2, %v643_v25  ;;  %3534 = vmatprep.mubr.msk.f32.mxu0 %vm559_vm2, %v4035_v15  ;;  %v4066_v40 = vld [vmem:[#allocation2 + $0x110] sm:$0xff]  ;;  %v4078_v43 = vld [vmem:[#allocation2 + $0x128] sm:$0xff]  ;;  %v1186_v17 = vrot.slane %v4055_v33, 1  ;;  %v1187_v18 = vrot.slane %v683_v62, 1  ;;  %v753_v20 = vrot.slane %v672_v63, 7 }
  0xe7   : > { %v1190_v21 = vrot.slane %v686_v5, 1  ;;  %v678_v24 = vld [vmem:[#allocation2 + $0x78] sm:$0xff]  ;;  %v681_v25 = vld [vmem:[#allocation2 + $0x90] sm:$0xff]  ;;  %v754_v26 = vrot.slane %v4030_v16, 7  ;;  %v1189_v27 = vrot.slane %v4064_v39, 1  ;;  %v4140_v29 = vsel %vm1167_vm3, %v1183_v1, %v1184_v4  ;;  %v684_v50 = vld [vmem:[#allocation2 + $0xa8] sm:$0xff] }
  0xe8   : > { %v4047_v31 = vld [vmem:[#allocation2 + $0xe0] sm:$0xff]  ;;  %v757_v37 = vrot.slane %v4035_v15, 7  ;;  %v1193_v42 = vrot.slane %v689_v19, 1  ;;  %v4159_v44 = vsel %vm1167_vm3, %v1186_v17, %v1187_v18  ;;  %v759_v45 = vrot.slane %v678_v24, 7  ;;  %v698_v57 = vld [vmem:[#allocation2 + $0x118] sm:$0xff]  ;;  %v704_v19 = vld [vmem:[#allocation2 + $0x148] sm:$0xff] }
  0xe9   : > { %v4049_v32 = vld [vmem:[#allocation2 + $0xf8] sm:$0xff]  ;;  %3535 = vmatmul.mubr.msk.f32.gmra.mxu0 %vm559_vm2, %v4045_v30  ;;  %3541 = vmatmul.mubr.msk.f32.vlgmr.msra.gmra.mxu1 %vm559_vm2, %v4047_v31  ;;  %v762_v47 = vrot.slane %v681_v25, 7  ;;  %v687_v53 = vld [vmem:[#allocation2 + $0xc0] sm:$0xff]  ;;  %v760_v54 = vrot.slane %v4045_v30, 7  ;;  %v4168_v55 = vsel %vm1167_vm3, %v1189_v27, %v1190_v21  ;;  %v1195_v56 = vrot.slane %v4047_v31, 1 }
  0xea   : > { %3553 = vmatpush3.msra.mxu1 %v3941_v14  ;;  %3537 = vmatprep.mubr.msk.f32.mxu0 %vm559_vm2, %v4055_v33  ;;  %v1172_v14 = vrot.slane %v668_v34, 1  ;;  %v4112_v2 = vld [vmem:[#allocation2 + $0x170] sm:$0xff]  ;;  %v692_v34 = vld [vmem:[#allocation2 + $0xe8] sm:$0xff]  ;;  %v4174_v59 = vld [vmem:[%s4793_s4 + $0x58] sm:$0xff]  ;;  %v1202_v1 = vrot.slane %v698_v57, 1  ;;  %v768_v4 = vrot.slane %v687_v53, 7 }
  0xeb   : > { %3543 = vmatprep.mubr.msk.f32.mxu1 %vm559_vm2, %v4049_v32  ;;  %3554 = vmatprep.subr.mxu1 %v792_v28  ;;  %v1196_v46 = vrot.slane %v692_v34, 1  ;;  %v4196_v17 = vsel %vm743_vm4, %v759_v45, %v760_v54  ;;  %v707_v21 = vld [vmem:[#allocation2 + $0x160] sm:$0xff]  ;;  %v1204_v24 = vrot.slane %v4078_v43, 1  ;;  %v1208_v34 = vrot.slane %v704_v19, 1  ;;  %v705_v19 = vld [vmem:[#allocation2 + $0x150] sm:$0xff] }
  0xec   : > { %3555 = vmatpush3.msra.mxu1 %v792_v28  ;;  %v4088_v51 = vld [vmem:[#allocation2 + $0x140] sm:$0xff]  ;;  %v4091_v52 = vsel %vm1167_vm3, %v1171_v38, %v1172_v14  ;;  %v4137_v28 = vsel %vm743_vm4, %v747_v61, %v748_v0  ;;  %v1192_v38 = vrot.slane %v4018_v22, 1  ;;  %v4153_v14 = vsel %vm743_vm4, %v750_v11, %v751_v7 }
  0xed   : > { %3538 = vmatmul.mubr.msk.f32.gmra.mxu0 %vm559_vm2, %v4064_v39  ;;  %3544 = vmatmul.mubr.msk.f32.gmra.mxu1 %vm559_vm2, %v4066_v40  ;;  %v4084_v48 = vld [vmem:[#allocation2 + $0x158] sm:$0xff]  ;;  %v1198_v61 = vrot.slane %v4049_v32, 1  ;;  %v765_v0 = vrot.slane %v684_v50, 7  ;;  %v766_v7 = vrot.slane %v4064_v39, 7  ;;  %v1201_v11 = vrot.slane %v4066_v40, 1 }
  0xee   : > { %3546 = vmatprep.mubr.msk.f32.mxu1 %vm559_vm2, %v4078_v43  ;;  %3584 = vmatprep.mubr.msk.f32.mxu0 %vm559_vm2, %v1170_v36  ;;  %v3201_v36 = vld [vmem:[%s4793_s4 + $0x30] sm:$0xff]  ;;  %v4186_v63 = vsel %vm1167_vm3, %v1192_v38, %v1193_v42  ;;  %v4199_v18 = vsel %vm1167_vm3, %v1195_v56, %v1196_v46  ;;  %v772_v45 = vrot.slane %v4047_v31, 7  ;;  %v696_v46 = vld [vmem:[#allocation2 + $0x108] sm:$0xff]  ;;  %v1210_v50 = vrot.slane %v4084_v48, 1  ;;  %v699_v56 = vld [vmem:[#allocation2 + $0x120] sm:$0xff] }
  0xef   : > { %3608 = vmatprep.subr.mxu1 %v4071_v41  ;;  %v4219_v38 = vsel %vm743_vm4, %v765_v0, %v766_v7  ;;  %v4222_v42 = vsel %vm1167_vm3, %v1201_v11, %v1202_v1  ;;  %v777_v57 = vrot.slane %v696_v46, 7  ;;  %v780_v7 = vrot.slane %v699_v56, 7  ;;  %v702_v11 = vld [vmem:[#allocation2 + $0x138] sm:$0xff]  ;;  %v1457_v56 = vld [vmem:[#allocation2 + $0x180] sm:$0xff] }
  0xf1   : > { %3547 = vmatmul.mubr.msk.f32.gmra.mxu1 %vm559_vm2, %v4088_v51  ;;  %3585 = vmatmul.mubr.msk.f32.vlgmr.msra.gmra.mxu0 %vm559_vm2, %v4091_v52 }
  0xf2   : > { %3549 = vmatprep.mubr.msk.f32.mxu1 %vm559_vm2, %v4084_v48  ;;  %3587 = vmatprep.mubr.msk.f32.mxu0 %vm559_vm2, %v4099_v13 }
  0xf3   : > { %3637 = vmatpush3.msra.mxu0 %v4024_v23  ;;  %v756_v23 = vrot.slane %v675_v6, 7  ;;  %v690_v6 = vld [vmem:[#allocation2 + $0xd8] sm:$0xff] }
  0xf4   : > { %3638 = vmatprep.subr.mxu0 %v3219_v58  ;;  %v771_v27 = vrot.slane %v690_v6, 7 }
  0xf5   : > { %3550 = vmatmul.mubr.msk.f32.gmra.mxu1 %vm559_vm2, %v4112_v2  ;;  %3588 = vmatmul.mubr.msk.f32.gmra.mxu0 %vm559_vm2, %v4115_v3  ;;  %v4183_v62 = vsel %vm743_vm4, %v756_v23, %v757_v37  ;;  %v769_v23 = vrot.slane %v4018_v22, 7  ;;  %v1207_v37 = vrot.slane %v4088_v51, 1 }
  0xf6   : > { %3590 = vmatprep.mubr.msk.f32.mxu0 %vm559_vm2, %v4123_v9  ;;  %3556 = vmatprep.mubr.msk.f32.mxu1 %vm559_vm2, %v746_v60  ;;  %v763_v60 = vrot.slane %v4055_v33, 7  ;;  %v4244_v0 = vsel %vm743_vm4, %v771_v27, %v772_v45  ;;  %v787_v27 = vrot.slane %v4084_v48, 7 }
  0xf7   : > { %3639 = vmatpush3.msra.mxu0 %v3219_v58  ;;  %v701_v58 = vld [vmem:[#allocation2 + $0x130] sm:$0xff]  ;;  %v4232_v53 = vsel %vm743_vm4, %v768_v4, %v769_v23  ;;  %v4247_v1 = vsel %vm1167_vm3, %v1207_v37, %v1208_v34  ;;  %v781_v4 = vrot.slane %v4078_v43, 7  ;;  %v790_v37 = vrot.slane %v4112_v2, 7 }
  0xf8   : > { %3692 = vmatprep.subr.mxu0 %v4128_v12  ;;  %v1205_v5 = vrot.slane %v701_v58, 1  ;;  %v4208_v25 = vsel %vm743_vm4, %v762_v47, %v763_v60  ;;  %v710_v47 = vld [vmem:[#allocation2 + $0x178] sm:$0xff]  ;;  %v778_v60 = vrot.slane %v4066_v40, 7 }
  0xf9   : > { %3557 = vmatmul.mubr.msk.f32.vlgmr.msra.gmra.mxu1 %vm559_vm2, %v4137_v28  ;;  %3591 = vmatmul.mubr.msk.f32.gmra.mxu0 %vm559_vm2, %v4140_v29  ;;  %v1214_v58 = vrot.slane %v710_v47, 1  ;;  %v4277_v34 = vsel %vm743_vm4, %v780_v7, %v781_v4 }
  0xfa   : > { %3609 = vmatpush3.msra.mxu1 %v4071_v41  ;;  %3559 = vmatprep.mubr.msk.f32.mxu1 %vm559_vm2, %v4153_v14  ;;  %v4165_v41 = vsel %vm743_vm4, %v753_v20, %v754_v26  ;;  %v693_v20 = vld [vmem:[#allocation2 + $0xf0] sm:$0xff]  ;;  %v4211_v26 = vsel %vm1167_vm3, %v1198_v61, %v1199_v49  ;;  %v775_v49 = vrot.slane %v4049_v32, 7  ;;  %v4235_v54 = vsel %vm1167_vm3, %v1204_v24, %v1205_v5 }
  0xfb   : > { %3593 = vmatprep.mubr.msk.f32.mxu0 %vm559_vm2, %v4159_v44  ;;  %3610 = vmatprep.subr.mxu1 %v3201_v36  ;;  %v774_v35 = vrot.slane %v693_v20, 7  ;;  %v1213_v61 = vrot.slane %v4112_v2, 1  ;;  %v784_v20 = vrot.slane %v4088_v51, 7  ;;  %v783_v24 = vrot.slane %v702_v11, 7 }
  0xfc   : > { %3611 = vmatpush3.msra.mxu1 %v3201_v36  ;;  %v1211_v36 = vrot.slane %v707_v21, 1  ;;  %v4266_v21 = vsel %vm743_vm4, %v777_v57, %v778_v60  ;;  %v3291_v60 = vld [vmem:[%s4793_s4 + $0x80] sm:$0xff] }
  0xfd   : > { %3560 = vmatmul.mubr.msk.f32.gmra.mxu1 %vm559_vm2, %v4165_v41  ;;  %3594 = vmatmul.mubr.msk.f32.gmra.mxu0 %vm559_vm2, %v4168_v55  ;;  %v4255_v5 = vsel %vm743_vm4, %v774_v35, %v775_v49  ;;  %v4269_v23 = vsel %vm1167_vm3, %v1213_v61, %v1214_v58  ;;  %v786_v35 = vrot.slane %v705_v19, 7  ;;  %v4285_v45 = vsel %vm743_vm4, %v783_v24, %v784_v20  ;;  %v3255_v49 = vld [vmem:[%s4793_s4 + $0x60] sm:$0xff] }
  0xfe   : > { %3562 = vmatprep.mubr.msk.f32.mxu1 %vm559_vm2, %v4183_v62  ;;  %3596 = vmatprep.mubr.msk.f32.mxu0 %vm559_vm2, %v4186_v63  ;;  %v4258_v6 = vsel %vm1167_vm3, %v1210_v50, %v1211_v36  ;;  %v708_v36 = vld [vmem:[#allocation2 + $0x168] sm:$0xff]  ;;  %v1537_v58 = vrot.slane %v1457_v56, 7 }
  0xff   : > { %3664 = vmatprep.subr.mxu1 %v4174_v59  ;;  %v789_v46 = vrot.slane %v708_v36, 7  ;;  %v4292_v47 = vsel %vm743_vm4, %v786_v35, %v787_v27  ;;  %v3292_v50 = vld [vmem:[%s4793_s4 + $0x88] sm:$0xff] }
 0x101   : > { %3563 = vmatmul.mubr.msk.f32.gmra.mxu1 %vm559_vm2, %v4196_v17  ;;  %3597 = vmatmul.mubr.msk.f32.gmra.mxu0 %vm559_vm2, %v4199_v18 }
 0x102   : > { %3565 = vmatprep.mubr.msk.f32.mxu1 %vm559_vm2, %v4208_v25  ;;  %3599 = vmatprep.mubr.msk.f32.mxu0 %vm559_vm2, %v4211_v26 }
 0x105   : > { %3566 = vmatmul.mubr.msk.f32.gmra.mxu1 %vm559_vm2, %v4219_v38  ;;  %3600 = vmatmul.mubr.msk.f32.gmra.mxu0 %vm559_vm2, %v4222_v42 }
 0x106   : > { %3568 = vmatprep.mubr.msk.f32.mxu1 %vm559_vm2, %v4232_v53  ;;  %3602 = vmatprep.mubr.msk.f32.mxu0 %vm559_vm2, %v4235_v54 }
 0x109   : > { %3569 = vmatmul.mubr.msk.f32.gmra.mxu1 %vm559_vm2, %v4244_v0  ;;  %3603 = vmatmul.mubr.msk.f32.gmra.mxu0 %vm559_vm2, %v4247_v1 }
 0x10a   : > { %3571 = vmatprep.mubr.msk.f32.mxu1 %vm559_vm2, %v4255_v5  ;;  %3605 = vmatprep.mubr.msk.f32.mxu0 %vm559_vm2, %v4258_v6 }
 0x10d   : > { %3572 = vmatmul.mubr.msk.f32.gmra.mxu1 %vm559_vm2, %v4266_v21  ;;  %3606 = vmatmul.mubr.msk.f32.gmra.mxu0 %vm559_vm2, %v4269_v23 }
 0x10e   : > { %3574 = vmatprep.mubr.msk.f32.mxu1 %vm559_vm2, %v4277_v34  ;;  %3640 = vmatprep.mubr.msk.f32.mxu0 %vm559_vm2, %v4002_v8  ;;  %v4303_v8 = vsel %vm743_vm4, %v789_v46, %v790_v37 }
 0x111   : > { %3575 = vmatmul.mubr.msk.f32.gmra.mxu1 %vm559_vm2, %v4285_v45  ;;  %3641 = vmatmul.mubr.msk.f32.vlgmr.msra.gmra.mxu0 %vm559_vm2, %v4004_v10 }
 0x112   : > { %3577 = vmatprep.mubr.msk.f32.mxu1 %vm559_vm2, %v4292_v47  ;;  %3643 = vmatprep.mubr.msk.f32.mxu0 %vm559_vm2, %v4030_v16 }
 0x113   : > { %3693 = vmatpush3.msra.mxu0 %v4128_v12  ;;  %v3237_v12 = vld [vmem:[%s4793_s4 + $0x50] sm:$0xff] }
 0x114   : > { %3694 = vmatprep.subr.mxu0 %v3255_v49 }
 0x115   : > { %3578 = vmatmul.mubr.msk.f32.gmra.mxu1 %vm559_vm2, %v4303_v8  ;;  %3644 = vmatmul.mubr.msk.f32.gmra.mxu0 %vm559_vm2, %v4035_v15 }
 0x116   : > { %3612 = vmatprep.mubr.msk.f32.mxu1 %vm559_vm2, %v4137_v28  ;;  %3646 = vmatprep.mubr.msk.f32.mxu0 %vm559_vm2, %v4045_v30  ;;  %v3274_v28 = vld [vmem:[%s4793_s4 + $0x78] sm:$0xff] }
 0x117   : > { %3695 = vmatpush3.msra.mxu0 %v3255_v49 }
 0x118   : > { %3748 = vmatprep.subr.mxu0 %v3292_v50 }
 0x119   : > { %3613 = vmatmul.mubr.msk.f32.vlgmr.msra.gmra.mxu1 %vm559_vm2, %v4153_v14  ;;  %3647 = vmatmul.mubr.msk.f32.gmra.mxu0 %vm559_vm2, %v4055_v33 }
 0x11a   : > { %3665 = vmatpush3.msra.mxu1 %v4174_v59  ;;  %3615 = vmatprep.mubr.msk.f32.mxu1 %vm559_vm2, %v4165_v41  ;;  %v4363_v59 = vld [vmem:[#allocation2 + $0x188] sm:$0xff] }
 0x11b   : > { %3649 = vmatprep.mubr.msk.f32.mxu0 %vm559_vm2, %v4064_v39  ;;  %3666 = vmatprep.subr.mxu1 %v3237_v12  ;;  %v1538_v57 = vrot.slane %v4363_v59, 7  ;;  %v1993_v61 = vrot.slane %v4363_v59, 1 }
 0x11c   : > { %3667 = vmatpush3.msra.mxu1 %v3237_v12 }
 0x11d   : > { %3616 = vmatmul.mubr.msk.f32.gmra.mxu1 %vm559_vm2, %v4183_v62  ;;  %3650 = vmatmul.mubr.msk.f32.gmra.mxu0 %vm559_vm2, %v4018_v22 }
 0x11e   : > { %3618 = vmatprep.mubr.msk.f32.mxu1 %vm559_vm2, %v4196_v17  ;;  %3652 = vmatprep.mubr.msk.f32.mxu0 %vm559_vm2, %v4047_v31 }
 0x11f   : > { %3720 = vmatprep.subr.mxu1 %v3274_v28 }
 0x121   : > { %3619 = vmatmul.mubr.msk.f32.gmra.mxu1 %vm559_vm2, %v4208_v25  ;;  %3653 = vmatmul.mubr.msk.f32.gmra.mxu0 %vm559_vm2, %v4049_v32 }
 0x122   : > { %3621 = vmatprep.mubr.msk.f32.mxu1 %vm559_vm2, %v4219_v38  ;;  %3655 = vmatprep.mubr.msk.f32.mxu0 %vm559_vm2, %v4066_v40 }
 0x125   : > { %3622 = vmatmul.mubr.msk.f32.gmra.mxu1 %vm559_vm2, %v4232_v53  ;;  %3656 = vmatmul.mubr.msk.f32.gmra.mxu0 %vm559_vm2, %v4078_v43 }
 0x126   : > { %3624 = vmatprep.mubr.msk.f32.mxu1 %vm559_vm2, %v4244_v0  ;;  %3658 = vmatprep.mubr.msk.f32.mxu0 %vm559_vm2, %v4088_v51 }
 0x129   : > { %3625 = vmatmul.mubr.msk.f32.gmra.mxu1 %vm559_vm2, %v4255_v5  ;;  %3659 = vmatmul.mubr.msk.f32.gmra.mxu0 %vm559_vm2, %v4084_v48 }
 0x12a   : > { %3627 = vmatprep.mubr.msk.f32.mxu1 %vm559_vm2, %v4266_v21  ;;  %3661 = vmatprep.mubr.msk.f32.mxu0 %vm559_vm2, %v4112_v2 }
 0x12d   : > { %3628 = vmatmul.mubr.msk.f32.gmra.mxu1 %vm559_vm2, %v4277_v34  ;;  %3662 = vmatmul.mubr.msk.f32.gmra.mxu0 %vm559_vm2, %v4363_v59 }
 0x12e   : > { %3630 = vmatprep.mubr.msk.f32.mxu1 %vm559_vm2, %v4285_v45  ;;  %3696 = vmatprep.mubr.msk.f32.mxu0 %vm559_vm2, %v4153_v14  ;;  %v1539_v14 = vsel %vm743_vm4, %v1537_v58, %v1538_v57 }
 0x131   : > { %3631 = vmatmul.mubr.msk.f32.gmra.mxu1 %vm559_vm2, %v4292_v47  ;;  %3697 = vmatmul.mubr.msk.f32.vlgmr.msra.gmra.mxu0 %vm559_vm2, %v4165_v41  ;;  %v3273_v41 = vld [vmem:[%s4793_s4 + $0x70] sm:$0xff] }
 0x132   : > { %3633 = vmatprep.mubr.msk.f32.mxu1 %vm559_vm2, %v4303_v8  ;;  %3699 = vmatprep.mubr.msk.f32.mxu0 %vm559_vm2, %v4183_v62  ;;  %v2239_v62 = vld [vmem:[#allocation2 + $0x1a0] sm:$0xff] }
 0x133   : > { %3749 = vmatpush3.msra.mxu0 %v3292_v50 }
 0x134   : > { %3750 = vmatprep.subr.mxu0 %v3291_v60 }
 0x135   : > { %3634 = vmatmul.mubr.msk.f32.gmra.mxu1 %vm559_vm2, %v1539_v14  ;;  %3700 = vmatmul.mubr.msk.f32.gmra.mxu0 %vm559_vm2, %v4196_v17 }
 0x136   : > { %3668 = vmatprep.mubr.msk.f32.mxu1 %vm559_vm2, %v4091_v52  ;;  %3702 = vmatprep.mubr.msk.f32.mxu0 %vm559_vm2, %v4208_v25  ;;  %v2238_v52 = vld [vmem:[#allocation2 + $0x198] sm:$0xff]  ;;  %v2319_v25 = vrot.slane %v2239_v62, 7 }
 0x137   : > { %3751 = vmatpush3.msra.mxu0 %v3291_v60  ;;  %v2318_v17 = vrot.slane %v2238_v52, 7 }
 0x139   : > { %3669 = vmatmul.mubr.msk.f32.vlgmr.msra.gmra.mxu1 %vm559_vm2, %v4099_v13  ;;  %3703 = vmatmul.mubr.msk.f32.gmra.mxu0 %vm559_vm2, %v4219_v38  ;;  %v2320_v38 = vsel %vm743_vm4, %v2318_v17, %v2319_v25 }
 0x13a   : > { %3721 = vmatpush3.msra.mxu1 %v3274_v28  ;;  %3671 = vmatprep.mubr.msk.f32.mxu1 %vm559_vm2, %v4115_v3 }
 0x13b   : > { %3705 = vmatprep.mubr.msk.f32.mxu0 %vm559_vm2, %v4232_v53  ;;  %3722 = vmatprep.subr.mxu1 %v3273_v41  ;;  %v1459_v53 = vld [vmem:[#allocation2 + $0x190] sm:$0xff] }
 0x13c   : > { %3723 = vmatpush3.msra.mxu1 %v3273_v41 }
 0x13d   : > { %3672 = vmatmul.mubr.msk.f32.gmra.mxu1 %vm559_vm2, %v4123_v9  ;;  %3706 = vmatmul.mubr.msk.f32.gmra.mxu0 %vm559_vm2, %v4244_v0  ;;  %v1994_v0 = vrot.slane %v1459_v53, 1 }
 0x13e   : > { %3674 = vmatprep.mubr.msk.f32.mxu1 %vm559_vm2, %v4140_v29  ;;  %3708 = vmatprep.mubr.msk.f32.mxu0 %vm559_vm2, %v4255_v5 }
 0x13f   : > { %v1995_v4 = vsel %vm1167_vm3, %v1993_v61, %v1994_v0 }
 0x141   : > { %3675 = vmatmul.mubr.msk.f32.gmra.mxu1 %vm559_vm2, %v4159_v44  ;;  %3709 = vmatmul.mubr.msk.f32.gmra.mxu0 %vm559_vm2, %v4266_v21 }
 0x142   : > { %3677 = vmatprep.mubr.msk.f32.mxu1 %vm559_vm2, %v4168_v55  ;;  %3711 = vmatprep.mubr.msk.f32.mxu0 %vm559_vm2, %v4277_v34 }
 0x145   : > { %3678 = vmatmul.mubr.msk.f32.gmra.mxu1 %vm559_vm2, %v4186_v63  ;;  %3712 = vmatmul.mubr.msk.f32.gmra.mxu0 %vm559_vm2, %v4285_v45 }
 0x146   : > { %3680 = vmatprep.mubr.msk.f32.mxu1 %vm559_vm2, %v4199_v18  ;;  %3714 = vmatprep.mubr.msk.f32.mxu0 %vm559_vm2, %v4292_v47 }
 0x149   : > { %3681 = vmatmul.mubr.msk.f32.gmra.mxu1 %vm559_vm2, %v4211_v26  ;;  %3715 = vmatmul.mubr.msk.f32.gmra.mxu0 %vm559_vm2, %v4303_v8 }
 0x14a   : > { %3683 = vmatprep.mubr.msk.f32.mxu1 %vm559_vm2, %v4222_v42  ;;  %3717 = vmatprep.mubr.msk.f32.mxu0 %vm559_vm2, %v1539_v14 }
 0x14d   : > { %3684 = vmatmul.mubr.msk.f32.gmra.mxu1 %vm559_vm2, %v4235_v54  ;;  %3718 = vmatmul.mubr.msk.f32.gmra.mxu0 %vm559_vm2, %v2320_v38 }
 0x14e   : > { %3686 = vmatprep.mubr.msk.f32.mxu1 %vm559_vm2, %v4247_v1  ;;  %3752 = vmatprep.mubr.msk.f32.mxu0 %vm559_vm2, %v4099_v13 }
 0x151   : > { %3687 = vmatmul.mubr.msk.f32.gmra.mxu1 %vm559_vm2, %v4258_v6  ;;  %3753 = vmatmul.mubr.msk.f32.vlgmr.msra.gmra.mxu0 %vm559_vm2, %v4115_v3 }
 0x152   : > { %3689 = vmatprep.mubr.msk.f32.mxu1 %vm559_vm2, %v4269_v23  ;;  %3755 = vmatprep.mubr.msk.f32.mxu0 %vm559_vm2, %v4123_v9 }
 0x155   : > { %3690 = vmatmul.mubr.msk.f32.gmra.mxu1 %vm559_vm2, %v1995_v4  ;;  %3756 = vmatmul.mubr.msk.f32.gmra.mxu0 %vm559_vm2, %v4140_v29 }
 0x156   : > { %3724 = vmatprep.mubr.msk.f32.mxu1 %vm559_vm2, %v4004_v10  ;;  %3758 = vmatprep.mubr.msk.f32.mxu0 %vm559_vm2, %v4159_v44  ;;  %v2240_v10 = vld [vmem:[#allocation2 + $0x1a8] sm:$0xff] }
 0x159   : > { %3725 = vmatmul.mubr.msk.f32.vlgmr.msra.gmra.mxu1 %vm559_vm2, %v4030_v16  ;;  %3759 = vmatmul.mubr.msk.f32.gmra.mxu0 %vm559_vm2, %v4168_v55  ;;  %v2774_v16 = vrot.slane %v2239_v62, 1 }
 0x15a   : > { %3727 = vmatprep.mubr.msk.f32.mxu1 %vm559_vm2, %v4035_v15  ;;  %3761 = vmatprep.mubr.msk.f32.mxu0 %vm559_vm2, %v4186_v63  ;;  %v2775_v15 = vrot.slane %v2240_v10, 1 }
 0x15d   : > { %3728 = vmatmul.mubr.msk.f32.gmra.mxu1 %vm559_vm2, %v4045_v30  ;;  %3762 = vmatmul.mubr.msk.f32.gmra.mxu0 %vm559_vm2, %v4199_v18 }
 0x15e   : > { %3730 = vmatprep.mubr.msk.f32.mxu1 %vm559_vm2, %v4055_v33  ;;  %3764 = vmatprep.mubr.msk.f32.mxu0 %vm559_vm2, %v4211_v26 }
 0x161   : > { %3731 = vmatmul.mubr.msk.f32.gmra.mxu1 %vm559_vm2, %v4064_v39  ;;  %3765 = vmatmul.mubr.msk.f32.gmra.mxu0 %vm559_vm2, %v4222_v42 }
 0x162   : > { %3733 = vmatprep.mubr.msk.f32.mxu1 %vm559_vm2, %v4018_v22  ;;  %3767 = vmatprep.mubr.msk.f32.mxu0 %vm559_vm2, %v4235_v54  ;;  %v2776_v22 = vsel %vm1167_vm3, %v2774_v16, %v2775_v15 }
 0x165   : > { %3734 = vmatmul.mubr.msk.f32.gmra.mxu1 %vm559_vm2, %v4047_v31  ;;  %3768 = vmatmul.mubr.msk.f32.gmra.mxu0 %vm559_vm2, %v4247_v1 }
 0x166   : > { %3736 = vmatprep.mubr.msk.f32.mxu1 %vm559_vm2, %v4049_v32  ;;  %3770 = vmatprep.mubr.msk.f32.mxu0 %vm559_vm2, %v4258_v6 }
 0x169   : > { %3737 = vmatmul.mubr.msk.f32.gmra.mxu1 %vm559_vm2, %v4066_v40  ;;  %3771 = vmatmul.mubr.msk.f32.gmra.mxu0 %vm559_vm2, %v4269_v23 }
 0x16a   : > { %3739 = vmatprep.mubr.msk.f32.mxu1 %vm559_vm2, %v4078_v43  ;;  %3773 = vmatprep.mubr.msk.f32.mxu0 %vm559_vm2, %v1995_v4 }
 0x16d   : > { %3740 = vmatmul.mubr.msk.f32.gmra.mxu1 %vm559_vm2, %v4088_v51  ;;  %3774 = vmatmul.mubr.msk.f32.gmra.mxu0 %vm559_vm2, %v2776_v22 }
 0x16e   : > { %3742 = vmatprep.mubr.msk.f32.mxu1 %vm559_vm2, %v4084_v48 }
 0x171   : > { %3743 = vmatmul.mubr.msk.f32.gmra.mxu1 %vm559_vm2, %v4112_v2 }
 0x172   : > { %3745 = vmatprep.mubr.msk.f32.mxu1 %vm559_vm2, %v4363_v59 }
 0x175   : > { %3746 = vmatmul.mubr.msk.f32.gmra.mxu1 %vm559_vm2, %v2239_v62 }
 0x1a1   : > { %v3530_v30 = vpop.f32.mrf.mxu0 }
 0x1a3   : > { %v895_v31 = vpop.f32.mrf.mxu0 }
 0x1a5   : > { %v3533_v32 = vpop.f32.mrf.mxu0 }
 0x1a7   : > { %v905_v33 = vpop.f32.mrf.mxu0 }
 0x1a9   : > { %v3536_v39 = vpop.f32.mrf.mxu0  ;;  %v3542_v40 = vpop.f32.mrf.mxu1 }
 0x1ab   : > { %v915_v43 = vpop.f32.mrf.mxu0  ;;  %v935_v51 = vpop.f32.mrf.mxu1 }
 0x1ad   : > { %v3539_v13 = vpop.f32.mrf.mxu0  ;;  %v3545_v3 = vpop.f32.mrf.mxu1 }
 0x1af   : > { %v925_v9 = vpop.f32.mrf.mxu0  ;;  %v945_v48 = vpop.f32.mrf.mxu1 }
 0x1b1   : > { %v3548_v29 = vpop.f32.mrf.mxu1  ;;  %v3586_v44 = vpop.f32.mrf.mxu0 }
 0x1b3   : > { %v955_v2 = vpop.f32.mrf.mxu1  ;;  %v1317_v55 = vpop.f32.mrf.mxu0 }
 0x1b5   : > { %v3551_v63 = vpop.f32.mrf.mxu1  ;;  %v3589_v18 = vpop.f32.mrf.mxu0 }
 0x1b7   : > { %v4510_v26 = vpop.f32.mrf.mxu1  ;;  %v1327_v42 = vpop.f32.mrf.mxu0 }
 0x1b9   : > { %v3558_v54 = vpop.f32.mrf.mxu1  ;;  %v3592_v1 = vpop.f32.mrf.mxu0 }
 0x1ba   : > { %v1078_v5 = vadd.f32 %v3558_v54, %v3530_v30 }
 0x1bb   : > { %v1072_v6 = vpop.f32.mrf.mxu1  ;;  %v1337_v7 = vpop.f32.mrf.mxu0 }
 0x1bc   : > { %v1073_v11 = vadd.f32 %v1072_v6, %v895_v31  ;;  %v4512_v19 = vadd.f32 %v3586_v44, %v1078_v5 }
 0x1bd   : > { %v3561_v20 = vpop.f32.mrf.mxu1  ;;  %v3595_v21 = vpop.f32.mrf.mxu0 }
 0x1be   : > { %v1088_v23 = vadd.f32 %v3561_v20, %v3533_v32  ;;  %v4514_v24 = vadd.f32 %v1317_v55, %v1073_v11 }
 0x1bf   : > { %v1082_v27 = vpop.f32.mrf.mxu1  ;;  %v1347_v34 = vpop.f32.mrf.mxu0 }
 0x1c0   : > { %v1083_v35 = vadd.f32 %v1082_v27, %v905_v33  ;;  %v4516_v36 = vadd.f32 %v3589_v18, %v1088_v23 }
 0x1c1   : > { %v3564_v37 = vpop.f32.mrf.mxu1  ;;  %v3598_v45 = vpop.f32.mrf.mxu0 }
 0x1c2   : > { %v1098_v46 = vadd.f32 %v3564_v37, %v3536_v39  ;;  %v4518_v47 = vadd.f32 %v1327_v42, %v1083_v35 }
 0x1c3   : > { %v1092_v49 = vpop.f32.mrf.mxu1  ;;  %v1357_v8 = vpop.f32.mrf.mxu0 }
 0x1c4   : > { %v1093_v50 = vadd.f32 %v1092_v49, %v915_v43  ;;  %v4520_v12 = vadd.f32 %v3592_v1, %v1098_v46 }
 0x1c5   : > { %v3567_v28 = vpop.f32.mrf.mxu1  ;;  %v3601_v59 = vpop.f32.mrf.mxu0 }
 0x1c6   : > { %v1108_v56 = vadd.f32 %v3567_v28, %v3539_v13  ;;  %v4522_v57 = vadd.f32 %v1337_v7, %v1093_v50 }
 0x1c7   : > { %v1102_v58 = vpop.f32.mrf.mxu1  ;;  %v1367_v60 = vpop.f32.mrf.mxu0 }
 0x1c8   : > { %v1103_v14 = vadd.f32 %v1102_v58, %v925_v9  ;;  %v4524_v41 = vadd.f32 %v3595_v21, %v1108_v56 }
 0x1c9   : > { %v3570_v52 = vpop.f32.mrf.mxu1  ;;  %v3604_v62 = vpop.f32.mrf.mxu0 }
 0x1ca   : > { %v1118_v17 = vadd.f32 %v3570_v52, %v3542_v40  ;;  %v4526_v25 = vadd.f32 %v1347_v34, %v1103_v14 }
 0x1cb   : > { %v1112_v38 = vpop.f32.mrf.mxu1  ;;  %v1377_v53 = vpop.f32.mrf.mxu0 }
 0x1cc   : > { %v1113_v61 = vadd.f32 %v1112_v38, %v935_v51  ;;  %v4528_v0 = vadd.f32 %v3598_v45, %v1118_v17 }
 0x1cd   : > { %v3573_v4 = vpop.f32.mrf.mxu1  ;;  %v3607_v10 = vpop.f32.mrf.mxu0 }
 0x1ce   : > { %v1128_v16 = vadd.f32 %v3573_v4, %v3545_v3  ;;  %v4530_v15 = vadd.f32 %v1357_v8, %v1113_v61 }
 0x1cf   : > { %v1122_v22 = vpop.f32.mrf.mxu1  ;;  %v1387_v30 = vpop.f32.mrf.mxu0 }
 0x1d0   : > { %v1123_v31 = vadd.f32 %v1122_v22, %v945_v48  ;;  %v4532_v32 = vadd.f32 %v3601_v59, %v1128_v16 }
 0x1d1   : > { %v3576_v33 = vpop.f32.mrf.mxu1  ;;  %v4534_v39 = vpop.f32.mrf.mxu0 }
 0x1d2   : > { %v1138_v40 = vadd.f32 %v3576_v33, %v3548_v29  ;;  %v4536_v43 = vadd.f32 %v1367_v60, %v1123_v31 }
 0x1d3   : > { %v1132_v13 = vpop.f32.mrf.mxu1  ;;  %v4538_v51 = vpop.f32.mrf.mxu0 }
 0x1d4   : > { %v1133_v9 = vadd.f32 %v1132_v13, %v955_v2  ;;  %v4540_v44 = vadd.f32 %v3604_v62, %v1138_v40 }
 0x1d5   : > { %v3579_v3 = vpop.f32.mrf.mxu1  ;;  %v4542_v55 = vpop.f32.mrf.mxu0 }
 0x1d6   : > { %v1148_v18 = vadd.f32 %v3579_v3, %v3551_v63  ;;  %v4544_v42 = vadd.f32 %v1377_v53, %v1133_v9 }
 0x1d7   : > { %v1142_v48 = vpop.f32.mrf.mxu1  ;;  %v4546_v54 = vpop.f32.mrf.mxu0 }
 0x1d8   : > { %4797 = vst [vmem:[#allocation3_spill] sm:$0xff] %v4544_v42  ;;  %v1143_v1 = vadd.f32 %v1142_v48, %v4510_v26  ;;  %v4549_v29 = vadd.f32 %v3607_v10, %v1148_v18 }
 0x1d9   : > { %v3614_v5 = vpop.f32.mrf.mxu1  ;;  %v4551_v6 = vpop.f32.mrf.mxu0 }
 0x1da   : > { %4798 = vst [vmem:[#allocation4_spill] sm:$0xff] %v4549_v29  ;;  %v4553_v7 = vadd.f32 %v1387_v30, %v1143_v1 }
 0x1db   : > { %v1641_v2 = vpop.f32.mrf.mxu1  ;;  %v4555_v11 = vpop.f32.mrf.mxu0 }
 0x1dc   : > { %4799 = vst [vmem:[#allocation5_spill] sm:$0xff] %v4553_v7 }
 0x1dd   : > { %v3617_v20 = vpop.f32.mrf.mxu1  ;;  %v4557_v21 = vpop.f32.mrf.mxu0 }
 0x1df   : > { %v1651_v63 = vpop.f32.mrf.mxu1  ;;  %v4559_v23 = vpop.f32.mrf.mxu0 }
 0x1e1   : > { %v3620_v27 = vpop.f32.mrf.mxu1  ;;  %v4561_v34 = vpop.f32.mrf.mxu0 }
 0x1e3   : > { %v1661_v26 = vpop.f32.mrf.mxu1  ;;  %v4563_v35 = vpop.f32.mrf.mxu0 }
 0x1e5   : > { %v3623_v37 = vpop.f32.mrf.mxu1  ;;  %v4565_v45 = vpop.f32.mrf.mxu0 }
 0x1e7   : > { %v1671_v46 = vpop.f32.mrf.mxu1  ;;  %v4567_v49 = vpop.f32.mrf.mxu0 }
 0x1e9   : > { %v4569_v8 = vpop.f32.mrf.mxu1  ;;  %v4571_v50 = vpop.f32.mrf.mxu0 }
 0x1ea   : > { %4800 = vst [vmem:[#allocation6_spill] sm:$0xff] %v4571_v50 }
 0x1eb   : > { %v4573_v28 = vpop.f32.mrf.mxu1  ;;  %v4575_v59 = vpop.f32.mrf.mxu0 }
 0x1ec   : > { %4801 = vst [vmem:[#allocation7_spill] sm:$0xff] %v4575_v59 }
 0x1ed   : > { %v4577_v56 = vpop.f32.mrf.mxu1  ;;  %v4579_v58 = vpop.f32.mrf.mxu0 }
 0x1ee   : > { %4802 = vst [vmem:[#allocation8_spill] sm:$0xff] %v4579_v58 }
 0x1ef   : > { %v4581_v60 = vpop.f32.mrf.mxu1  ;;  %v4583_v14 = vpop.f32.mrf.mxu0 }
 0x1f0   : > { %4803 = vst [vmem:[#allocation9_spill] sm:$0xff] %v4583_v14 }
 0x1f1   : > { %v4585_v52 = vpop.f32.mrf.mxu1  ;;  %v3698_v62 = vpop.f32.mrf.mxu0 }
 0x1f3   : > { %v4587_v17 = vpop.f32.mrf.mxu1  ;;  %v2422_v38 = vpop.f32.mrf.mxu0 }
 0x1f4   : > { %4804 = vst [vmem:[#allocation10_spill] sm:$0xff] %v4587_v17 }
 0x1f5   : > { %v4589_v53 = vpop.f32.mrf.mxu1  ;;  %v4591_v61 = vpop.f32.mrf.mxu0 }
 0x1f6   : > { %4805 = vst [vmem:[#allocation11_spill] sm:$0xff] %v4589_v53 }
 0x1f7   : > { %v4593_v4 = vpop.f32.mrf.mxu1  ;;  %v4595_v10 = vpop.f32.mrf.mxu0 }
 0x1f8   : > { %4806 = vst [vmem:[#allocation12_spill] sm:$0xff] %v4593_v4 }
 0x1f9   : > { %v3670_v16 = vpop.f32.mrf.mxu1  ;;  %v4597_v22 = vpop.f32.mrf.mxu0 }
 0x1fb   : > { %v2097_v30 = vpop.f32.mrf.mxu1  ;;  %v4599_v31 = vpop.f32.mrf.mxu0 }
 0x1fd   : > { %v3673_v33 = vpop.f32.mrf.mxu1  ;;  %v4601_v40 = vpop.f32.mrf.mxu0 }
 0x1fe   : > { %4807 = vst [vmem:[#allocation13_spill] sm:$0xff] %v4601_v40 }
 0x1ff   : > { %v2107_v13 = vpop.f32.mrf.mxu1  ;;  %v4603_v9 = vpop.f32.mrf.mxu0 }
 0x200   : > { %4808 = vst [vmem:[#allocation14_spill] sm:$0xff] %v4603_v9 }
 0x201   : > { %v3676_v3 = vpop.f32.mrf.mxu1  ;;  %v4605_v18 = vpop.f32.mrf.mxu0 }
 0x202   : > { %4809 = vst [vmem:[#allocation15_spill] sm:$0xff] %v4605_v18 }
 0x203   : > { %v2117_v48 = vpop.f32.mrf.mxu1  ;;  %v4607_v1 = vpop.f32.mrf.mxu0 }
 0x204   : > { %4810 = vst [vmem:[#allocation16_spill] sm:$0xff] %v4607_v1  ;;  %v1721_v1 = vadd.f32 %v3614_v5, %v4512_v19 }
 0x205   : > { %v4609_v14 = vpop.f32.mrf.mxu1  ;;  %v4611_v58 = vpop.f32.mrf.mxu0 }
 0x206   : > { %4811 = vst [vmem:[#allocation17_spill] sm:$0xff] %v4611_v58 }
 0x207   : > { %v4613_v59 = vpop.f32.mrf.mxu1  ;;  %v4615_v4 = vpop.f32.mrf.mxu0 }
 0x208   : > { %4812 = vst [vmem:[#allocation18_spill] sm:$0xff] %v4615_v4  ;;  %v1720_v4 = vadd.f32 %v1641_v2, %v4514_v24  ;;  %v1725_v24 = vadd.f32 %v3620_v27, %v4520_v12 }
 0x209   : > { %v4617_v7 = vpop.f32.mrf.mxu1  ;;  %v4619_v50 = vpop.f32.mrf.mxu0 }
 0x20a   : > { %4813 = vst [vmem:[#allocation19_spill] sm:$0xff] %v4617_v7  ;;  %4814 = vst [vmem:[#allocation20_spill] sm:$0xff] %v4619_v50  ;;  %v1723_v50 = vadd.f32 %v3617_v20, %v4516_v36  ;;  %v1916_v19 = vadd.f32 %v4538_v51, %v1720_v4  ;;  %v1724_v36 = vadd.f32 %v1661_v26, %v4522_v57 }
 0x20b   : > { %v4621_v53 = vpop.f32.mrf.mxu1  ;;  %v4623_v9 = vpop.f32.mrf.mxu0  ;;  %v1729_v4 = vadd.f32 %v4569_v8, %v4528_v0  ;;  %v4665_v0 = vld [vmem:[%s4794_s5] ss:$0 sm:$0xff] }
 0x20c   : > { %4815 = vst [vmem:[#allocation21_spill] sm:$0xff] %v4621_v53  ;;  %4816 = vst [vmem:[#allocation22_spill] sm:$0xff] %v4623_v9  ;;  %v1917_v53 = vadd.f32 %v4534_v39, %v1721_v1  ;;  %v2176_v2 = vadd.f32 %v2097_v30, %v1916_v19  ;;  %v1727_v39 = vadd.f32 %v3623_v37, %v4524_v41 }
 0x20d   : > { %v4625_v18 = vpop.f32.mrf.mxu1  ;;  %v4627_v29 = vpop.f32.mrf.mxu0  ;;  %v1728_v41 = vadd.f32 %v4573_v28, %v4530_v15  ;;  %v1920_v37 = vadd.f32 %v4555_v11, %v1724_v36  ;;  %v4675_v28 = vld [vmem:[%s4795_s6] ss:$0 sm:$0xff]  ;;  %v4821_v36 = vld [vmem:[#allocation3_spill] sm:$0xff] }
 0x20e   : > { %4817 = vst [vmem:[#allocation23_spill] sm:$0xff] %v4625_v18  ;;  %4818 = vst [vmem:[#allocation24_spill] sm:$0xff] %v4627_v29  ;;  %v1722_v29 = vadd.f32 %v1651_v63, %v4518_v47  ;;  %v2177_v42 = vadd.f32 %v3670_v16, %v1917_v53  ;;  %v1726_v47 = vadd.f32 %v1671_v46, %v4526_v25 }
 0x20f   : > { %v4630_v40 = vpop.f32.mrf.mxu1  ;;  %v4632_v58 = vpop.f32.mrf.mxu0  ;;  %v2501_v26 = vadd.f32 %v2422_v38, %v2176_v2  ;;  %v1731_v25 = vadd.f32 %v4577_v56, %v4532_v32  ;;  %v1730_v32 = vadd.f32 %v4581_v60, %v4536_v43  ;;  %v2180_v11 = vadd.f32 %v2117_v48, %v1920_v37 }
 0x210   : > { %4819 = vst [vmem:[#allocation25_spill] sm:$0xff] %v4632_v58  ;;  %v1918_v51 = vadd.f32 %v4546_v54, %v1722_v29  ;;  %v2502_v53 = vadd.f32 %v3698_v62, %v2177_v42  ;;  %v1923_v42 = vadd.f32 %v4557_v21, %v1727_v39  ;;  %v1925_v21 = vadd.f32 %v4561_v34, %v1729_v4  ;;  %v4822_v39 = vld [vmem:[#allocation10_spill] sm:$0xff] }
 0x211   : > { %v4635_v17 = vpop.f32.mrf.mxu1  ;;  %v3754_v7 = vpop.f32.mrf.mxu0  ;;  %v1733_v43 = vadd.f32 %v4585_v52, %v4540_v44  ;;  %v1924_v34 = vadd.f32 %v4563_v35, %v1728_v41  ;;  %v1926_v35 = vadd.f32 %v4567_v49, %v1730_v32  ;;  %v4827_v41 = vld [vmem:[#allocation6_spill] sm:$0xff] }
 0x212   : > { %4820 = vst [vmem:[#allocation26_spill] sm:$0xff] %v4635_v17  ;;  %v1919_v17 = vadd.f32 %v4542_v55, %v1723_v50  ;;  %v2178_v16 = vadd.f32 %v2107_v13, %v1918_v51  ;;  %v1921_v55 = vadd.f32 %v4551_v6, %v1725_v24  ;;  %v1922_v6 = vadd.f32 %v4559_v23, %v1726_v47 }
 0x213   : > { %v4639_v9 = vpop.f32.mrf.mxu1  ;;  %v2878_v18 = vpop.f32.mrf.mxu0  ;;  %v2183_v60 = vadd.f32 %v4609_v14, %v1923_v42  ;;  %v1732_v47 = vadd.f32 %v4822_v39, %v4821_v36 }
 0x214   : > { %v2179_v63 = vadd.f32 %v3673_v33, %v1919_v17  ;;  %v2181_v50 = vadd.f32 %v3676_v3, %v1921_v55  ;;  %v2503_v38 = vadd.f32 %v4595_v10, %v2178_v16  ;;  %v2182_v44 = vadd.f32 %v4613_v59, %v1922_v6 }
 0x215   : > { %v4643_v5 = vpop.f32.mrf.mxu1  ;;  %v3757_v58 = vpop.f32.mrf.mxu0  ;;  %v2505_v10 = vadd.f32 %v4599_v31, %v2180_v11 }
 0x216   : > { %v2504_v15 = vadd.f32 %v4591_v61, %v2179_v63  ;;  %v1927_v61 = vadd.f32 %v4565_v45, %v1731_v25  ;;  %v2506_v45 = vadd.f32 %v4597_v22, %v2181_v50  ;;  %v4823_v63 = vld [vmem:[#allocation19_spill] sm:$0xff]  ;;  %v4824_v22 = vld [vmem:[#allocation13_spill] sm:$0xff]  ;;  %v1929_v25 = vadd.f32 %v4827_v41, %v1733_v43 }
 0x217   : > { %v4649_v20 = vpop.f32.mrf.mxu1  ;;  %v2888_v1 = vpop.f32.mrf.mxu0  ;;  %v2185_v59 = vadd.f32 %v4823_v63, %v1925_v21  ;;  %v2508_v4 = vadd.f32 %v4824_v22, %v2183_v60  ;;  %v4829_v50 = vld [vmem:[#allocation21_spill] sm:$0xff]  ;;  %v4830_v21 = vld [vmem:[#allocation23_spill] sm:$0xff] }
 0x218   : > { %v2184_v11 = vadd.f32 %v4829_v50, %v1924_v34  ;;  %v2186_v34 = vadd.f32 %v4630_v40, %v1926_v35  ;;  %v4836_v40 = vld [vmem:[#allocation16_spill] sm:$0xff] }
 0x219   : > { %v3726_v12 = vpop.f32.mrf.mxu1  ;;  %v3760_v27 = vpop.f32.mrf.mxu0 }
 0x21a   : > { %v2698_v57 = vadd.f32 %v3726_v12, %v2502_v53  ;;  %v2509_v35 = vadd.f32 %v4836_v40, %v2184_v11 }
 0x21b   : > { %v2618_v54 = vpop.f32.mrf.mxu1  ;;  %v2898_v29 = vpop.f32.mrf.mxu0 }
 0x21c   : > { %v2958_v46 = vadd.f32 %v3754_v7, %v2698_v57  ;;  %v2697_v8 = vadd.f32 %v2618_v54, %v2501_v26  ;;  %v4826_v57 = vld [vmem:[#allocation11_spill] sm:$0xff]  ;;  %v4828_v54 = vld [vmem:[#allocation14_spill] sm:$0xff] }
 0x21d   : > { %v3729_v56 = vpop.f32.mrf.mxu1  ;;  %v3763_v62 = vpop.f32.mrf.mxu0  ;;  %v2507_v6 = vadd.f32 %v4828_v54, %v2182_v44 }
 0x21e   : > { %v2981_v7 = vmul.f32 %v4665_v0, %v2958_v46  ;;  %v2957_v23 = vadd.f32 %v2878_v18, %v2697_v8  ;;  %v2700_v17 = vadd.f32 %v3729_v56, %v2504_v15  ;;  %v2187_v56 = vadd.f32 %v4830_v21, %v1927_v61 }
 0x21f   : > { %v2628_v30 = vpop.f32.mrf.mxu1  ;;  %v2908_v33 = vpop.f32.mrf.mxu0 }
 0x220   : > { %v3004_v13 = vadd.f32 %v4675_v28, %v2981_v7  ;;  %v2980_v3 = vmul.f32 %v4665_v0, %v2957_v23  ;;  %v2960_v48 = vadd.f32 %v3757_v58, %v2700_v17  ;;  %v2699_v18 = vadd.f32 %v2628_v30, %v2503_v38 }
 0x221   : > { %v3732_v14 = vpop.f32.mrf.mxu1  ;;  %v3766_v52 = vpop.f32.mrf.mxu0 }
 0x222   : > { %v3020_v19 = vmax.f32 %v3004_v13, 0.0  ;;  %v3003_v58 = vadd.f32 %v4675_v28, %v2980_v3  ;;  %v2983_v24 = vmul.f32 %v4665_v0, %v2960_v48  ;;  %v2959_v2 = vadd.f32 %v2888_v1, %v2699_v18  ;;  %v4825_v1 = vld [vmem:[#allocation4_spill] sm:$0xff]  ;;  %v4834_v18 = vld [vmem:[#allocation7_spill] sm:$0xff] }
 0x223   : > { %v2702_v51 = vadd.f32 %v3732_v14, %v2506_v45  ;;  %v2638_v49 = vpop.f32.mrf.mxu1  ;;  %v2918_v53 = vpop.f32.mrf.mxu0  ;;  %v1735_v26 = vadd.f32 %v4826_v57, %v4825_v1  ;;  %v4833_v3 = vld [vmem:[#allocation12_spill] sm:$0xff]  ;;  %v1928_v61 = vadd.f32 %v4834_v18, %v1732_v47  ;;  %v4837_v47 = vld [vmem:[#allocation17_spill] sm:$0xff] }
 0x224   : > { %3036 = vst.msk [vmem:[%s4691_s18 + $0x8] sm:$0xff] %vm559_vm2, %v3020_v19  ;;  %v3019_v31 = vmax.f32 %v3003_v58, 0.0  ;;  %v3006_v12 = vadd.f32 %v4675_v28, %v2983_v24  ;;  %v2982_v16 = vmul.f32 %v4665_v0, %v2959_v2  ;;  %v2701_v55 = vadd.f32 %v2638_v49, %v2505_v10  ;;  %v4835_v58 = vld [vmem:[#allocation26_spill] sm:$0xff] }
 0x225   : > { %v2962_v37 = vadd.f32 %v3760_v27, %v2702_v51  ;;  %v3735_v42 = vpop.f32.mrf.mxu1  ;;  %v3769_v23 = vpop.f32.mrf.mxu0  ;;  %v4831_v27 = vld [vmem:[#allocation15_spill] sm:$0xff]  ;;  %v2189_v24 = vadd.f32 %v4835_v58, %v1929_v25  ;;  %v2512_v63 = vadd.f32 %v4837_v47, %v2187_v56  ;;  %v4839_v25 = vld [vmem:[#allocation8_spill] sm:$0xff] }
 0x226   : > { %3035 = vst.msk [vmem:[%s4691_s18] sm:$0xff] %vm559_vm2, %v3019_v31  ;;  %v3022_v46 = vmax.f32 %v3006_v12, 0.0  ;;  %v3005_v8 = vadd.f32 %v4675_v28, %v2982_v16  ;;  %v2961_v15 = vadd.f32 %v2898_v29, %v2701_v55  ;;  %v2704_v32 = vadd.f32 %v3735_v42, %v2508_v4  ;;  %v4832_v29 = vld [vmem:[#allocation5_spill] sm:$0xff]  ;;  %v4838_v12 = vld [vmem:[#allocation18_spill] sm:$0xff] }
 0x227   : > { %v2985_v7 = vmul.f32 %v4665_v0, %v2962_v37  ;;  %v2648_v17 = vpop.f32.mrf.mxu1  ;;  %v2510_v38 = vadd.f32 %v4831_v27, %v2185_v59  ;;  %v1734_v48 = vadd.f32 %v4833_v3, %v4832_v29  ;;  %v2928_v36 = vpop.f32.mrf.mxu0  ;;  %v2188_v4 = vadd.f32 %v4639_v9, %v1928_v61 }
 0x228   : > { %3038 = vst.msk [vmem:[%s4691_s18 + $0x18] sm:$0xff] %vm559_vm2, %v3022_v46  ;;  %v3021_v43 = vmax.f32 %v3005_v8, 0.0  ;;  %v2984_v60 = vmul.f32 %v4665_v0, %v2961_v15  ;;  %v2964_v30 = vadd.f32 %v3763_v62, %v2704_v32  ;;  %v2703_v13 = vadd.f32 %v2648_v17, %v2507_v6  ;;  %v4841_v46 = vld [vmem:[#allocation20_spill] sm:$0xff]  ;;  %v4842_v17 = vld [vmem:[#allocation22_spill] sm:$0xff] }
 0x229   : > { %v3008_v44 = vadd.f32 %v4675_v28, %v2985_v7  ;;  %v3738_v45 = vpop.f32.mrf.mxu1  ;;  %v2511_v16 = vadd.f32 %v4838_v12, %v2186_v34  ;;  %v1931_v37 = vadd.f32 %v4839_v25, %v1735_v26  ;;  %v3772_v42 = vpop.f32.mrf.mxu0  ;;  %v2514_v8 = vadd.f32 %v4841_v46, %v2189_v24  ;;  %v4843_v34 = vld [vmem:[#allocation24_spill] sm:$0xff] }
 0x22a   : > { %3037 = vst.msk [vmem:[%s4691_s18 + $0x10] sm:$0xff] %vm559_vm2, %v3021_v43  ;;  %v3007_v14 = vadd.f32 %v4675_v28, %v2984_v60  ;;  %v2987_v10 = vmul.f32 %v4665_v0, %v2964_v30  ;;  %v2963_v19 = vadd.f32 %v2908_v33, %v2703_v13  ;;  %v2706_v62 = vadd.f32 %v3738_v45, %v2510_v38  ;;  %v4844_v45 = vld [vmem:[#allocation25_spill] sm:$0xff] }
 0x22b   : > { %v3024_v2 = vmax.f32 %v3008_v44, 0.0  ;;  %v2658_v39 = vpop.f32.mrf.mxu1  ;;  %v2191_v21 = vadd.f32 %v4643_v5, %v1931_v37 }
 0x22c   : > { %v3023_v59 = vmax.f32 %v3007_v14, 0.0  ;;  %v3010_v51 = vadd.f32 %v4675_v28, %v2987_v10  ;;  %v2986_v49 = vmul.f32 %v4665_v0, %v2963_v19  ;;  %v2966_v22 = vadd.f32 %v3766_v52, %v2706_v62  ;;  %v4840_v52 = vld [vmem:[#allocation9_spill] sm:$0xff] }
 0x22d   : > { %3040 = vst.msk [vmem:[%s4691_s18 + $0x28] sm:$0xff] %vm559_vm2, %v3024_v2  ;;  %v2705_v33 = vadd.f32 %v2658_v39, %v2509_v35  ;;  %v3741_v31 = vpop.f32.mrf.mxu1  ;;  %v1930_v9 = vadd.f32 %v4840_v52, %v1734_v48  ;;  %v2516_v18 = vadd.f32 %v4843_v34, %v2191_v21 }
 0x22e   : > { %3039 = vst.msk [vmem:[%s4691_s18 + $0x20] sm:$0xff] %vm559_vm2, %v3023_v59  ;;  %v3026_v55 = vmax.f32 %v3010_v51, 0.0  ;;  %v3009_v1 = vadd.f32 %v4675_v28, %v2986_v49  ;;  %v2989_v57 = vmul.f32 %v4665_v0, %v2966_v22  ;;  %v2708_v41 = vadd.f32 %v3741_v31, %v2512_v63 }
 0x22f   : > { %v2965_v54 = vadd.f32 %v2918_v53, %v2705_v33  ;;  %v2668_v6 = vpop.f32.mrf.mxu1  ;;  %v2190_v26 = vadd.f32 %v4649_v20, %v1930_v9  ;;  %v2513_v53 = vadd.f32 %v4842_v17, %v2188_v4 }
 0x230   : > { %3042 = vst.msk [vmem:[%s4691_s18 + $0x38] sm:$0xff] %vm559_vm2, %v3026_v55  ;;  %v3025_v15 = vmax.f32 %v3009_v1, 0.0  ;;  %v3012_v32 = vadd.f32 %v4675_v28, %v2989_v57  ;;  %v2968_v50 = vadd.f32 %v3769_v23, %v2708_v41  ;;  %v2707_v11 = vadd.f32 %v2668_v6, %v2511_v16  ;;  %v2938_v23 = vpop.f32.mrf.mxu0 }
 0x231   : > { %v2988_v56 = vmul.f32 %v4665_v0, %v2965_v54  ;;  %v3744_v7 = vpop.f32.mrf.mxu1  ;;  %v2515_v14 = vadd.f32 %v4844_v45, %v2190_v26 }
 0x232   : > { %3041 = vst.msk [vmem:[%s4691_s18 + $0x30] sm:$0xff] %vm559_vm2, %v3025_v15  ;;  %v3028_v27 = vmax.f32 %v3012_v32, 0.0  ;;  %v2991_v38 = vmul.f32 %v4665_v0, %v2968_v50  ;;  %v2967_v43 = vadd.f32 %v2928_v36, %v2707_v11  ;;  %v2710_v60 = vadd.f32 %v3744_v7, %v2514_v8  ;;  %v3775_v44 = vpop.f32.mrf.mxu0 }
 0x233   : > { %v3011_v30 = vadd.f32 %v4675_v28, %v2988_v56  ;;  %v2678_v13 = vpop.f32.mrf.mxu1 }
 0x234   : > { %3044 = vst.msk [vmem:[%s4691_s18 + $0x48] sm:$0xff] %vm559_vm2, %v3028_v27  ;;  %v3014_v5 = vadd.f32 %v4675_v28, %v2991_v38  ;;  %v2990_v20 = vmul.f32 %v4665_v0, %v2967_v43  ;;  %v2970_v29 = vadd.f32 %v3772_v42, %v2710_v60  ;;  %v2709_v3 = vadd.f32 %v2678_v13, %v2513_v53  ;;  %v2948_v63 = vpop.f32.mrf.mxu0 }
 0x235   : > { %v3027_v48 = vmax.f32 %v3011_v30, 0.0  ;;  %v3747_v61 = vpop.f32.mrf.mxu1 }
 0x236   : > { %v3030_v10 = vmax.f32 %v3014_v5, 0.0  ;;  %v3013_v19 = vadd.f32 %v4675_v28, %v2990_v20  ;;  %v2993_v62 = vmul.f32 %v4665_v0, %v2970_v29  ;;  %v2969_v58 = vadd.f32 %v2938_v23, %v2709_v3 }
 0x237   : > { %3043 = vst.msk [vmem:[%s4691_s18 + $0x40] sm:$0xff] %vm559_vm2, %v3027_v48  ;;  %v2712_v24 = vadd.f32 %v3747_v61, %v2516_v18  ;;  %v2688_v2 = vpop.f32.mrf.mxu1 }
 0x238   : > { %3046 = vst.msk [vmem:[%s4691_s18 + $0x58] sm:$0xff] %vm559_vm2, %v3030_v10  ;;  %v3029_v36 = vmax.f32 %v3013_v19, 0.0  ;;  %v3016_v40 = vadd.f32 %v4675_v28, %v2993_v62  ;;  %v2992_v35 = vmul.f32 %v4665_v0, %v2969_v58  ;;  %v2711_v39 = vadd.f32 %v2688_v2, %v2515_v14 }
 0x239   : > { %v2972_v47 = vadd.f32 %v3775_v44, %v2712_v24 }
 0x23a   : > { %3045 = vst.msk [vmem:[%s4691_s18 + $0x50] sm:$0xff] %vm559_vm2, %v3029_v36  ;;  %v3032_v59 = vmax.f32 %v3016_v40, 0.0  ;;  %v3015_v51 = vadd.f32 %v4675_v28, %v2992_v35  ;;  %v2971_v49 = vadd.f32 %v2948_v63, %v2711_v39 }
 0x23b   : > { %v2995_v22 = vmul.f32 %v4665_v0, %v2972_v47 }
 0x23c   : > { %3048 = vst.msk [vmem:[%s4691_s18 + $0x68] sm:$0xff] %vm559_vm2, %v3032_v59  ;;  %v3031_v4 = vmax.f32 %v3015_v51, 0.0  ;;  %v2994_v33 = vmul.f32 %v4665_v0, %v2971_v49 }
 0x23d   : > { %v3018_v31 = vadd.f32 %v4675_v28, %v2995_v22 }
 0x23e   : > { %3047 = vst.msk [vmem:[%s4691_s18 + $0x60] sm:$0xff] %vm559_vm2, %v3031_v4  ;;  %v3017_v12 = vadd.f32 %v4675_v28, %v2994_v33 }
 0x23f   : > { %v3034_v16 = vmax.f32 %v3018_v31, 0.0 }
 0x240   : > { %v3033_v55 = vmax.f32 %v3017_v12, 0.0 }
 0x241   : > { %3050 = vst.msk [vmem:[%s4691_s18 + $0x78] sm:$0xff] %vm559_vm2, %v3034_v16 }
 0x242   : > { %3049 = vst.msk [vmem:[%s4691_s18 + $0x70] sm:$0xff] %vm559_vm2, %v3033_v55 }
 0x243 PF: > { %s17_s24 = sadd.s32 1, %s3795_s24  }
 0x244   : > { %p14_p4 = scmp.ge.s32.totalorder %s17_s24, 4  }
 0x246   :  { %16 = sbr.rel (!%p14_p4) target bundleno = 1 (0x1), region = 92 }

</bundles_post_ra>
